<compile_context>
chip_gen: v5e
topology: v5e:2x2
jax: 0.10.0
libtpu: 0.0.40
codegen_flags: <defaults>
</compile_context>

<pallas_src>
import functools

import jax
import jax.numpy as jnp
from jax import lax
from jax.experimental import pallas as pl
from jax.experimental.pallas import tpu as pltpu


_RHS_RESIDENT_BYTES = 12 * 1024 * 1024   # keep resident weight << v7x VMEM
_VMEM_LIMIT_BYTES = 40 * 1024 * 1024     # safe on v5e/v6e (128 MiB) and v7x (64 MiB)


def _round_up(x, m):
    return (x + m - 1) // m * m


# ---------------------------------------------------------------------------
# Pass 1: tiled im2col matmul (atrous conv) + per-channel sum / sum-of-squares
# ---------------------------------------------------------------------------
def _conv_stats_kernel(lhs_ref, rhs_ref, out_ref, stats_ref, acc_ref, *,
                       tk, rhs_resident):
    k = pl.program_id(2)

    @pl.when(k == 0)
    def _():
        acc_ref[...] = jnp.zeros_like(acc_ref)

    if rhs_resident:
        # Weight is fully VMEM-resident; slice the current K-tile out of it.
        koff = pl.multiple_of(k * tk, tk)
        rhs_tile = rhs_ref[pl.ds(koff, tk), :]
    else:
        rhs_tile = rhs_ref[...]

    # Operands stay in their storage dtype; accumulate in f32 on the MXU.
    acc_ref[...] += jnp.dot(lhs_ref[...], rhs_tile,
                            preferred_element_type=jnp.float32)

    @pl.when(k == pl.num_programs(2) - 1)
    def _():
        out_ref[...] = acc_ref[...].astype(out_ref.dtype)
        # Per-channel partial statistics for this row tile, computed in 128-row
        # slabs read back from the VMEM accumulator to bound vreg pressure.
        tm_, tn_ = acc_ref.shape
        s = jnp.zeros((1, tn_), jnp.float32)
        ss = jnp.zeros((1, tn_), jnp.float32)
        r = 0
        while r < tm_:
            c = min(128, tm_ - r)
            a = acc_ref[r:r + c, :]
            s = s + jnp.sum(a, axis=0, keepdims=True)
            ss = ss + jnp.sum(a * a, axis=0, keepdims=True)
            r += c
        stats_ref[...] = jnp.concatenate(
            [s, ss, jnp.zeros((6, tn_), jnp.float32)], axis=0)   # (8, tn)


# ---------------------------------------------------------------------------
# Pass 2: pure y * scale + shift -> ReLU stream (scale/shift precomputed)
# ---------------------------------------------------------------------------
def _scale_shift_relu_kernel(y_ref, scale_ref, shift_ref, o_ref):
    y = y_ref[...].astype(jnp.float32) * scale_ref[...] + shift_ref[...]
    o_ref[...] = jnp.maximum(y, 0.0).astype(o_ref.dtype)


# ---------------------------------------------------------------------------
# Wrapper: NCHW <-> NHWC glue, im2col, channel padding, two pallas_calls
# ---------------------------------------------------------------------------
@functools.partial(
    jax.jit,
    static_argnames=("padding", "dilation", "eps", "tm_pref", "tk_pref",
                     "compute_dtype", "conv_out_dtype"))
def aspp_forward(x_nchw, weight_oihw, gamma, beta, *, padding, dilation,
                 eps=1e-5, tm_pref=512, tk_pref=512,
                 compute_dtype=None, conv_out_dtype=None):
    """Forward pass of _ASPPModule. x_nchw: (N, Cin, H, W) like PyTorch."""
    N, Cin, H, W = x_nchw.shape
    Cout, Cin_w, KH, KW = weight_oihw.shape
    assert Cin_w == Cin, (Cin_w, Cin)
    Hout = H + 2 * padding - dilation * (KH - 1)
    Wout = W + 2 * padding - dilation * (KW - 1)
    assert Hout > 0 and Wout > 0, "invalid padding/dilation for this input"

    op_dtype = jnp.dtype(compute_dtype) if compute_dtype is not None \
        else x_nchw.dtype
    conv_dtype = jnp.dtype(conv_out_dtype) if conv_out_dtype is not None \
        else jnp.float32

    # NCHW -> NHWC, zero-pad spatial dims (XLA fuses these layout passes).
    # TODO(synk): fold the KH*KW taps into the Pallas grid (implicit im2col)
    # so the 9x-sized lhs never materializes in HBM.
    x = jnp.transpose(x_nchw, (0, 2, 3, 1)).astype(op_dtype)
    xp = jnp.pad(x, ((0, 0), (padding, padding), (padding, padding), (0, 0)))

    # im2col: fold the KH*KW taps into the contraction so each grid step runs
    # one large MXU matmul (K = KH*KW*Cin) instead of KH*KW skinny ones.
    cols = []
    for kh in range(KH):
        for kw in range(KW):
            cols.append(
                lax.slice(xp,
                          (0, kh * dilation, kw * dilation, 0),
                          (N, kh * dilation + Hout, kw * dilation + Wout, Cin)))
    lhs = jnp.concatenate(cols, axis=-1).reshape(N * Hout * Wout, KH * KW * Cin)
    # Weight OIHW -> (KH*KW*Cin, Cout), same channel ordering as the im2col.
    rhs = jnp.transpose(weight_oihw, (2, 3, 1, 0)).reshape(KH * KW * Cin, Cout)
    rhs = rhs.astype(op_dtype)

    M, K = lhs.shape

    # ---- tile selection (lane-dense, clamped to the problem) --------------
    C_p = _round_up(Cout, 128)
    if C_p <= 256:
        tn = C_p                       # nt == 1: lhs streamed from HBM once
    elif C_p % 256 == 0:
        tn = 256
    else:
        tn = 128
    tk = min(tk_pref, _round_up(K, 128))
    tm = min(tm_pref, _round_up(M, 8))
    K_p = _round_up(K, tk)
    M_p = _round_up(M, tm)
    mt, nt, kt = M_p // tm, C_p // tn, K_p // tk

    itemsize = jnp.dtype(op_dtype).itemsize
    rhs_resident = (nt == 1) and (K_p * C_p * itemsize <= _RHS_RESIDENT_BYTES)

    lhs_p = jnp.pad(lhs, ((0, M_p - M), (0, K_p - K)))
    rhs_p = jnp.pad(rhs, ((0, K_p - K), (0, C_p - Cout)))

    if rhs_resident:
        rhs_spec = pl.BlockSpec((K_p, C_p), lambda i, j, k: (0, 0))
    else:
        rhs_spec = pl.BlockSpec((tk, tn), lambda i, j, k: (k, j))

    conv_kernel = functools.partial(_conv_stats_kernel, tk=tk,
                                    rhs_resident=rhs_resident)

    # ---- Pass 1: conv matmul + per-channel partial stats -------------------
    conv_out, stats = pl.pallas_call(
        conv_kernel,
        out_shape=(jax.ShapeDtypeStruct((M_p, C_p), conv_dtype),
                   jax.ShapeDtypeStruct((mt * 8, C_p), jnp.float32)),
        grid_spec=pltpu.PrefetchScalarGridSpec(
            num_scalar_prefetch=0,
            grid=(mt, nt, kt),
            in_specs=[pl.BlockSpec((tm, tk), lambda i, j, k: (i, k)),
                      rhs_spec],
            out_specs=[pl.BlockSpec((tm, tn), lambda i, j, k: (i, j)),
                       pl.BlockSpec((8, tn), lambda i, j, k: (i, j))],
            scratch_shapes=[pltpu.VMEM((tm, tn), jnp.float32)]),
        compiler_params=pltpu.CompilerParams(
            dimension_semantics=("parallel", "parallel", "arbitrary"),
            vmem_limit_bytes=_VMEM_LIMIT_BYTES),
    )(lhs_p, rhs_p)

    # ---- BN batch stats -> scale / shift on tiny (1, C_p) arrays (XLA) -----
    # (padded rows/channels are exactly zero, so they contribute nothing; we
    #  divide by the true element count M = N*Hout*Wout)
    inv_n = 1.0 / float(M)
    ch_sum = jnp.sum(stats[0::8, :], axis=0, keepdims=True)   # (1, C_p)
    ch_ssq = jnp.sum(stats[1::8, :], axis=0, keepdims=True)   # (1, C_p)
    mean = ch_sum * inv_n
    var = jnp.maximum(ch_ssq * inv_n - mean * mean, 0.0)      # biased batch var
    g_p = jnp.pad(gamma.astype(jnp.float32).reshape(1, Cout),
                  ((0, 0), (0, C_p - Cout)))
    b_p = jnp.pad(beta.astype(jnp.float32).reshape(1, Cout),
                  ((0, 0), (0, C_p - Cout)))
    scale = g_p * lax.rsqrt(var + eps)
    shift = b_p - mean * scale
    # TODO(synk): PyTorch training-mode BN also updates running_mean/var; that
    # stateful side effect is not reproduced here (forward output matches).

    # ---- Pass 2: normalize + ReLU, large mem-bound tiles --------------------
    if C_p <= 512:
        tn2 = C_p
    elif C_p % 512 == 0:
        tn2 = 512
    elif C_p % 256 == 0:
        tn2 = 256
    else:
        tn2 = 128

    y_p = pl.pallas_call(
        _scale_shift_relu_kernel,
        out_shape=jax.ShapeDtypeStruct((M_p, C_p), x_nchw.dtype),
        grid=(mt, C_p // tn2),
        in_specs=[pl.BlockSpec((tm, tn2), lambda i, j: (i, j)),
                  pl.BlockSpec((1, tn2), lambda i, j: (0, j)),
                  pl.BlockSpec((1, tn2), lambda i, j: (0, j))],
        out_specs=pl.BlockSpec((tm, tn2), lambda i, j: (i, j)),
        compiler_params=pltpu.CompilerParams(
            dimension_semantics=("parallel", "parallel"),
            vmem_limit_bytes=_VMEM_LIMIT_BYTES),
    )(conv_out, scale, shift)

    # Strip padding, back to NCHW to match the PyTorch module.
    y = y_p[:M, :Cout].reshape(N, Hout, Wout, Cout)
    return jnp.transpose(y, (0, 3, 1, 2))


# ---------------------------------------------------------------------------
# Pure-JAX reference (for the self-check in __main__)
# ---------------------------------------------------------------------------
def _reference(x, w, gamma, beta, padding, dilation, eps):
    y = lax.conv_general_dilated(
        x, w, window_strides=(1, 1),
        padding=((padding, padding), (padding, padding)),
        rhs_dilation=(dilation, dilation),
        dimension_numbers=("NCHW", "OIHW", "NCHW"),
        precision=lax.Precision.HIGHEST)
    mean = jnp.mean(y, axis=(0, 2, 3), keepdims=True)
    var = jnp.mean((y - mean) ** 2, axis=(0, 2, 3), keepdims=True)
    yn = (y - mean) * lax.rsqrt(var + eps)
    yn = yn * gamma.reshape(1, -1, 1, 1) + beta.reshape(1, -1, 1, 1)
    return jnp.maximum(yn, 0.0)


if __name__ == "__main__":
    # Small, deterministic example consistent with _ASPPModule:
    #   inplanes=4, planes=8, kernel_size=3, dilation=2, padding=2 (ASPP branch)
    N, Cin, H, W = 2, 4, 16, 16
    Cout, Kk, dilation, padding = 8, 3, 2, 2

    key = jax.random.PRNGKey(0)
    kx, kw = jax.random.split(key)

    x = jax.random.normal(kx, (N, Cin, H, W), dtype=jnp.float32)

    # kaiming_normal_ (fan_in mode, gain=sqrt(2)): std = sqrt(2 / (Cin*K*K))
    std = (2.0 / (Cin * Kk * Kk)) ** 0.5
    weight = std * jax.random.normal(kw, (Cout, Cin, Kk, Kk), dtype=jnp.float32)

    # BatchNorm affine params from _init_weight: weight=1, bias=0.
    gamma = jnp.ones((Cout,), dtype=jnp.float32)
    beta = jnp.zeros((Cout,), dtype=jnp.float32)

    out = aspp_forward(x, weight, gamma, beta, padding=padding,
                       dilation=dilation)
    out = jax.block_until_ready(out)
    assert out.shape == (N, Cout, H, W), out.shape

    ref = _reference(x, weight, gamma, beta, padding, dilation, 1e-5)
    max_err = float(jnp.max(jnp.abs(out - ref)))
    assert jnp.allclose(out, ref, rtol=5e-3, atol=5e-3), max_err

    print("KERNEL_OK")
</pallas_src>

<mosaic_0001>
module attributes {stable_mosaic.version = 11 : i64} {
  func.func @_conv_stats_kernel(%arg0: i32, %arg1: i32, %arg2: i32, %arg3: memref<512x128xf32, #tpu.memory_space<vmem>>, %arg4: memref<128x128xf32, #tpu.memory_space<vmem>>, %arg5: memref<512x128xf32, #tpu.memory_space<vmem>>, %arg6: memref<8x128xf32, #tpu.memory_space<vmem>>, %arg7: memref<512x128xf32, #tpu.memory_space<vmem>>) attributes {dimension_semantics = [#tpu.dimension_semantics<parallel>, #tpu.dimension_semantics<parallel>, #tpu.dimension_semantics<arbitrary>], iteration_bounds = array<i64: 1, 1, 1>, scalar_prefetch = 0 : i64, scratch_operands = 1 : i64, tpu.core_type = #tpu.core_type<tc>, window_params = [{transform_indices = @transform_0, window_bounds = array<i64: 512, 128>}, {pipeline_mode = #tpu.pipeline_mode<synchronous>, transform_indices = @transform_1, window_bounds = array<i64: 128, 128>}, {transform_indices = @transform_2, window_bounds = array<i64: 512, 128>}, {transform_indices = @transform_3, window_bounds = array<i64: 8, 128>}]} {
    %c0_i32 = arith.constant 0 : i32
    %0 = arith.cmpi eq, %arg2, %c0_i32 : i32
    %1 = arith.extui %0 : i1 to i32
    %c0_i32_0 = arith.constant 0 : i32
    %2 = arith.cmpi ne, %1, %c0_i32_0 : i32
    scf.if %2 {
      %cst_9 = arith.constant 0.000000e+00 : f32
      %15 = vector.broadcast %cst_9 : f32 to vector<512x128xf32>
      %c0_10 = arith.constant 0 : index
      %c0_11 = arith.constant 0 : index
      %16 = vector.load %arg7[%c0_10, %c0_11] : memref<512x128xf32, #tpu.memory_space<vmem>>, vector<512x128xf32>
      tpu.vector_store %arg7[%c0_10, %c0_11], %15 {strides = array<i32>} : memref<512x128xf32, #tpu.memory_space<vmem>>, vector<512x128xf32>,
    } else {
    }
    %c128_i32 = arith.constant 128 : i32
    %3 = arith.muli %arg2, %c128_i32 : i32
    %4 = tpu.assume_multiple %3, 128 : i32
    %5 = arith.index_cast %4 : i32 to index
    %c0 = arith.constant 0 : index
    %6 = vector.load %arg4[%5, %c0] : memref<128x128xf32, #tpu.memory_space<vmem>>, vector<128x128xf32>
    %c0_1 = arith.constant 0 : index
    %c0_2 = arith.constant 0 : index
    %7 = vector.load %arg7[%c0_1, %c0_2] : memref<512x128xf32, #tpu.memory_space<vmem>>, vector<512x128xf32>
    %c0_3 = arith.constant 0 : index
    %c0_4 = arith.constant 0 : index
    %8 = vector.load %arg3[%c0_3, %c0_4] : memref<512x128xf32, #tpu.memory_space<vmem>>, vector<512x128xf32>
    %cst = arith.constant dense<0.000000e+00> : vector<512x128xf32>
    %9 = tpu.matmul %8, %6, %cst {dimension_numbers = #tpu.dot_dimension_numbers<[1], [0], [0], [1], [0, 0, 1, 1], [], []>} : vector<512x128xf32>, vector<128x128xf32>, vector<512x128xf32> -> vector<512x128xf32>
    %10 = arith.addf %7, %9 : vector<512x128xf32>
    %c0_5 = arith.constant 0 : index
    %c0_6 = arith.constant 0 : index
    %11 = vector.load %arg7[%c0_5, %c0_6] : memref<512x128xf32, #tpu.memory_space<vmem>>, vector<512x128xf32>
    tpu.vector_store %arg7[%c0_5, %c0_6], %10 {strides = array<i32>} : memref<512x128xf32, #tpu.memory_space<vmem>>, vector<512x128xf32>,
    %c0_i32_7 = arith.constant 0 : i32
    %12 = arith.cmpi eq, %arg2, %c0_i32_7 : i32
    %13 = arith.extui %12 : i1 to i32
    %c0_i32_8 = arith.constant 0 : i32
    %14 = arith.cmpi ne, %13, %c0_i32_8 : i32
    scf.if %14 {
      %c0_9 = arith.constant 0 : index
      %c0_10 = arith.constant 0 : index
      %15 = vector.load %arg7[%c0_9, %c0_10] : memref<512x128xf32, #tpu.memory_space<vmem>>, vector<512x128xf32>
      %c0_11 = arith.constant 0 : index
      %c0_12 = arith.constant 0 : index
      %16 = vector.load %arg5[%c0_11, %c0_12] : memref<512x128xf32, #tpu.memory_space<vmem>>, vector<512x128xf32>
      tpu.vector_store %arg5[%c0_11, %c0_12], %15 {strides = array<i32>} : memref<512x128xf32, #tpu.memory_space<vmem>>, vector<512x128xf32>,
      %cst_13 = arith.constant 0.000000e+00 : f32
      %17 = vector.broadcast %cst_13 : f32 to vector<1x128xf32>
      %cst_14 = arith.constant 0.000000e+00 : f32
      %18 = vector.broadcast %cst_14 : f32 to vector<1x128xf32>
      %c0_15 = arith.constant 0 : index
      %c0_16 = arith.constant 0 : index
      %19 = vector.load %arg7[%c0_15, %c0_16] : memref<512x128xf32, #tpu.memory_space<vmem>>, vector<128x128xf32>
      %cst_17 = arith.constant dense<0.000000e+00> : vector<128xf32>
      %20 = vector.multi_reduction <add>, %19, %cst_17 [0] : vector<128x128xf32> to vector<128xf32>
      %21 = vector.shape_cast %20 : vector<128xf32> to vector<1x128xf32>
      %22 = arith.addf %17, %21 : vector<1x128xf32>
      %23 = arith.mulf %19, %19 : vector<128x128xf32>
      %cst_18 = arith.constant dense<0.000000e+00> : vector<128xf32>
      %24 = vector.multi_reduction <add>, %23, %cst_18 [0] : vector<128x128xf32> to vector<128xf32>
      %25 = vector.shape_cast %24 : vector<128xf32> to vector<1x128xf32>
      %26 = arith.addf %18, %25 : vector<1x128xf32>
      %c128 = arith.constant 128 : index
      %c0_19 = arith.constant 0 : index
      %27 = vector.load %arg7[%c128, %c0_19] : memref<512x128xf32, #tpu.memory_space<vmem>>, vector<128x128xf32>
      %cst_20 = arith.constant dense<0.000000e+00> : vector<128xf32>
      %28 = vector.multi_reduction <add>, %27, %cst_20 [0] : vector<128x128xf32> to vector<128xf32>
      %29 = vector.shape_cast %28 : vector<128xf32> to vector<1x128xf32>
      %30 = arith.addf %22, %29 : vector<1x128xf32>
      %31 = arith.mulf %27, %27 : vector<128x128xf32>
      %cst_21 = arith.constant dense<0.000000e+00> : vector<128xf32>
      %32 = vector.multi_reduction <add>, %31, %cst_21 [0] : vector<128x128xf32> to vector<128xf32>
      %33 = vector.shape_cast %32 : vector<128xf32> to vector<1x128xf32>
      %34 = arith.addf %26, %33 : vector<1x128xf32>
      %c256 = arith.constant 256 : index
      %c0_22 = arith.constant 0 : index
      %35 = vector.load %arg7[%c256, %c0_22] : memref<512x128xf32, #tpu.memory_space<vmem>>, vector<128x128xf32>
      %cst_23 = arith.constant dense<0.000000e+00> : vector<128xf32>
      %36 = vector.multi_reduction <add>, %35, %cst_23 [0] : vector<128x128xf32> to vector<128xf32>
      %37 = vector.shape_cast %36 : vector<128xf32> to vector<1x128xf32>
      %38 = arith.addf %30, %37 : vector<1x128xf32>
      %39 = arith.mulf %35, %35 : vector<128x128xf32>
      %cst_24 = arith.constant dense<0.000000e+00> : vector<128xf32>
      %40 = vector.multi_reduction <add>, %39, %cst_24 [0] : vector<128x128xf32> to vector<128xf32>
      %41 = vector.shape_cast %40 : vector<128xf32> to vector<1x128xf32>
      %42 = arith.addf %34, %41 : vector<1x128xf32>
      %c384 = arith.constant 384 : index
      %c0_25 = arith.constant 0 : index
      %43 = vector.load %arg7[%c384, %c0_25] : memref<512x128xf32, #tpu.memory_space<vmem>>, vector<128x128xf32>
      %cst_26 = arith.constant dense<0.000000e+00> : vector<128xf32>
      %44 = vector.multi_reduction <add>, %43, %cst_26 [0] : vector<128x128xf32> to vector<128xf32>
      %45 = vector.shape_cast %44 : vector<128xf32> to vector<1x128xf32>
      %46 = arith.addf %38, %45 : vector<1x128xf32>
      %47 = arith.mulf %43, %43 : vector<128x128xf32>
      %cst_27 = arith.constant dense<0.000000e+00> : vector<128xf32>
      %48 = vector.multi_reduction <add>, %47, %cst_27 [0] : vector<128x128xf32> to vector<128xf32>
      %49 = vector.shape_cast %48 : vector<128xf32> to vector<1x128xf32>
      %50 = arith.addf %42, %49 : vector<1x128xf32>
      %cst_28 = arith.constant 0.000000e+00 : f32
      %51 = vector.broadcast %cst_28 : f32 to vector<6x128xf32>
      %52 = tpu.concatenate %46, %50, %51 in 0 : vector<1x128xf32>, vector<1x128xf32>, vector<6x128xf32> -> vector<8x128xf32>
      %c0_29 = arith.constant 0 : index
      %c0_30 = arith.constant 0 : index
      %53 = vector.load %arg6[%c0_29, %c0_30] : memref<8x128xf32, #tpu.memory_space<vmem>>, vector<8x128xf32>
      tpu.vector_store %arg6[%c0_29, %c0_30], %52 {strides = array<i32>} : memref<8x128xf32, #tpu.memory_space<vmem>>, vector<8x128xf32>,
    } else {
    }
    return
  }
  func.func @transform_0(%arg0: i32, %arg1: i32, %arg2: i32) -> (i32, i32) {
    %c0_i32 = arith.constant 0 : i32
    return %arg0, %arg2 : i32, i32
  }
  func.func @transform_1(%arg0: i32, %arg1: i32, %arg2: i32) -> (i32, i32) {
    %c0_i32 = arith.constant 0 : i32
    %c0_i32_0 = arith.constant 0 : i32
    %c0_i32_1 = arith.constant 0 : i32
    return %c0_i32, %c0_i32_0 : i32, i32
  }
  func.func @transform_2(%arg0: i32, %arg1: i32, %arg2: i32) -> (i32, i32) {
    %c0_i32 = arith.constant 0 : i32
    return %arg0, %arg1 : i32, i32
  }
  func.func @transform_3(%arg0: i32, %arg1: i32, %arg2: i32) -> (i32, i32) {
    %c0_i32 = arith.constant 0 : i32
    return %arg0, %arg1 : i32, i32
  }
}

module attributes {stable_mosaic.version = 11 : i64} {
  func.func @_scale_shift_relu_kernel(%arg0: i32, %arg1: i32, %arg2: memref<512x128xf32, #tpu.memory_space<vmem>>, %arg3: memref<1x128xf32, #tpu.memory_space<vmem>>, %arg4: memref<1x128xf32, #tpu.memory_space<vmem>>, %arg5: memref<512x128xf32, #tpu.memory_space<vmem>>) attributes {dimension_semantics = [#tpu.dimension_semantics<parallel>, #tpu.dimension_semantics<parallel>], iteration_bounds = array<i64: 1, 1>, scalar_prefetch = 0 : i64, scratch_operands = 0 : i64, tpu.core_type = #tpu.core_type<tc>, window_params = [{transform_indices = @transform_0, window_bounds = array<i64: 512, 128>}, {transform_indices = @transform_1, window_bounds = array<i64: 1, 128>}, {transform_indices = @transform_2, window_bounds = array<i64: 1, 128>}, {transform_indices = @transform_3, window_bounds = array<i64: 512, 128>}]} {
    %c0 = arith.constant 0 : index
    %c0_0 = arith.constant 0 : index
    %0 = vector.load %arg2[%c0, %c0_0] : memref<512x128xf32, #tpu.memory_space<vmem>>, vector<512x128xf32>
    %c0_1 = arith.constant 0 : index
    %c0_2 = arith.constant 0 : index
    %1 = vector.load %arg3[%c0_1, %c0_2] : memref<1x128xf32, #tpu.memory_space<vmem>>, vector<1x128xf32>
    %2 = vector.broadcast %1 : vector<1x128xf32> to vector<512x128xf32>
    %3 = arith.mulf %0, %2 : vector<512x128xf32>
    %c0_3 = arith.constant 0 : index
    %c0_4 = arith.constant 0 : index
    %4 = vector.load %arg4[%c0_3, %c0_4] : memref<1x128xf32, #tpu.memory_space<vmem>>, vector<1x128xf32>
    %5 = vector.broadcast %4 : vector<1x128xf32> to vector<512x128xf32>
    %6 = arith.addf %3, %5 : vector<512x128xf32>
    %cst = arith.constant 0.000000e+00 : f32
    %7 = vector.broadcast %cst : f32 to vector<512x128xf32>
    %8 = arith.maximumf %6, %7 : vector<512x128xf32>
    %c0_5 = arith.constant 0 : index
    %c0_6 = arith.constant 0 : index
    %9 = vector.load %arg5[%c0_5, %c0_6] : memref<512x128xf32, #tpu.memory_space<vmem>>, vector<512x128xf32>
    tpu.vector_store %arg5[%c0_5, %c0_6], %8 {strides = array<i32>} : memref<512x128xf32, #tpu.memory_space<vmem>>, vector<512x128xf32>,
    return
  }
  func.func @transform_0(%arg0: i32, %arg1: i32) -> (i32, i32) {
    %c0_i32 = arith.constant 0 : i32
    return %arg0, %arg1 : i32, i32
  }
  func.func @transform_1(%arg0: i32, %arg1: i32) -> (i32, i32) {
    %c0_i32 = arith.constant 0 : i32
    %c0_i32_0 = arith.constant 0 : i32
    return %c0_i32, %arg1 : i32, i32
  }
  func.func @transform_2(%arg0: i32, %arg1: i32) -> (i32, i32) {
    %c0_i32 = arith.constant 0 : i32
    %c0_i32_0 = arith.constant 0 : i32
    return %c0_i32, %arg1 : i32, i32
  }
  func.func @transform_3(%arg0: i32, %arg1: i32) -> (i32, i32) {
    %c0_i32 = arith.constant 0 : i32
    return %arg0, %arg1 : i32, i32
  }
}

</mosaic_0001>

<bundles_post_ra>
// kernel: aspp_forward.3
= control target key start
LH: loop header
LB: loop body
LE: loop exit
PB: predicated region body
PF: predicated region fallthrough
CT: control target
= control target key end

     0   :  { %s893_s0 = inlined_call_operand.vmem [shape: f32[512,128], index: 0, kind: input, shape index: {}]   ;;  %s894_s1 = inlined_call_operand.vmem [shape: f32[1,128], index: 1, kind: input, shape index: {}]   ;;  %s895_s2 = inlined_call_operand.vmem [shape: f32[1,128], index: 2, kind: input, shape index: {}]   ;;  %s896_s3 = inlined_call_operand.vmem [shape: f32[512,128], index: 3, kind: output, shape index: {}]  }
   0x1   :  { %v14_v0 = vld [vmem:[%s893_s0] sm:$0xff]  ;;  %v15_v3 = vld [vmem:[%s893_s0 + $0x8] sm:$0xff]  ;;  %v16_v6 = vld [vmem:[%s893_s0 + $0x10] sm:$0xff] }
   0x2   :  { %v374_v1 = vld [vmem:[%s894_s1] ss:$0 sm:$0xff]  ;;  %v17_v7 = vld [vmem:[%s893_s0 + $0x18] sm:$0xff]  ;;  %v19_v12 = vld [vmem:[%s893_s0 + $0x28] sm:$0xff] }
   0x3   :  { %v379_v2 = vld [vmem:[%s895_s2] ss:$0 sm:$0xff]  ;;  %v82_v4 = vmul.f32 %v374_v1, %v14_v0  ;;  %v83_v5 = vmul.f32 %v374_v1, %v15_v3  ;;  %v84_v9 = vmul.f32 %v374_v1, %v16_v6  ;;  %v85_v10 = vmul.f32 %v374_v1, %v17_v7  ;;  %v20_v13 = vld [vmem:[%s893_s0 + $0x30] sm:$0xff]  ;;  %v21_v14 = vld [vmem:[%s893_s0 + $0x38] sm:$0xff] }
   0x4   :  { %v18_v8 = vld [vmem:[%s893_s0 + $0x20] sm:$0xff]  ;;  %v87_v17 = vmul.f32 %v374_v1, %v19_v12  ;;  %v88_v18 = vmul.f32 %v374_v1, %v20_v13  ;;  %v89_v22 = vmul.f32 %v374_v1, %v21_v14  ;;  %v23_v24 = vld [vmem:[%s893_s0 + $0x48] sm:$0xff]  ;;  %v24_v29 = vld [vmem:[%s893_s0 + $0x50] sm:$0xff] }
   0x5   :  { %v86_v11 = vmul.f32 %v374_v1, %v18_v8  ;;  %v150_v15 = vadd.f32 %v379_v2, %v82_v4  ;;  %v151_v16 = vadd.f32 %v379_v2, %v83_v5  ;;  %v152_v19 = vadd.f32 %v379_v2, %v84_v9  ;;  %v22_v23 = vld [vmem:[%s893_s0 + $0x40] sm:$0xff]  ;;  %v25_v30 = vld [vmem:[%s893_s0 + $0x58] sm:$0xff]  ;;  %v27_v35 = vld [vmem:[%s893_s0 + $0x68] sm:$0xff] }
   0x6   :  { %v153_v20 = vadd.f32 %v379_v2, %v85_v10  ;;  %v155_v27 = vadd.f32 %v379_v2, %v87_v17  ;;  %v156_v28 = vadd.f32 %v379_v2, %v88_v18  ;;  %v26_v31 = vld [vmem:[%s893_s0 + $0x60] sm:$0xff]  ;;  %v157_v34 = vadd.f32 %v379_v2, %v89_v22  ;;  %v28_v36 = vld [vmem:[%s893_s0 + $0x70] sm:$0xff]  ;;  %v29_v41 = vld [vmem:[%s893_s0 + $0x78] sm:$0xff] }
   0x7   :  { %v154_v21 = vadd.f32 %v379_v2, %v86_v11  ;;  %v214_v25 = vmax.f32 %v150_v15, 0.0  ;;  %v215_v26 = vmax.f32 %v151_v16, 0.0  ;;  %v216_v32 = vmax.f32 %v152_v19, 0.0  ;;  %v30_v54 = vld [vmem:[%s893_s0 + $0x80] sm:$0xff]  ;;  %v31_v55 = vld [vmem:[%s893_s0 + $0x88] sm:$0xff]  ;;  %v32_v58 = vld [vmem:[%s893_s0 + $0x90] sm:$0xff] }
   0x8   :  { %v217_v33 = vmax.f32 %v153_v20, 0.0  ;;  %v219_v38 = vmax.f32 %v155_v27, 0.0  ;;  %v90_v39 = vmul.f32 %v374_v1, %v22_v23  ;;  %v91_v40 = vmul.f32 %v374_v1, %v23_v24  ;;  %v33_v59 = vld [vmem:[%s893_s0 + $0x98] sm:$0xff]  ;;  %v34_v62 = vld [vmem:[%s893_s0 + $0xa0] sm:$0xff]  ;;  %v35_v5 = vld [vmem:[%s893_s0 + $0xa8] sm:$0xff] }
   0x9   :  { %278 = vst [vmem:[%s896_s3] sm:$0xff] %v214_v25  ;;  %v218_v37 = vmax.f32 %v154_v21, 0.0  ;;  %v220_v42 = vmax.f32 %v156_v28, 0.0  ;;  %v92_v43 = vmul.f32 %v374_v1, %v24_v29  ;;  %v93_v44 = vmul.f32 %v374_v1, %v25_v30  ;;  %v36_v10 = vld [vmem:[%s893_s0 + $0xb0] sm:$0xff]  ;;  %v37_v14 = vld [vmem:[%s893_s0 + $0xb8] sm:$0xff]  ;;  %v38_v18 = vld [vmem:[%s893_s0 + $0xc0] sm:$0xff] }
   0xa   :  { %279 = vst [vmem:[%s896_s3 + $0x8] sm:$0xff] %v215_v26  ;;  %v94_v45 = vmul.f32 %v374_v1, %v26_v31  ;;  %v158_v46 = vadd.f32 %v379_v2, %v90_v39  ;;  %v159_v47 = vadd.f32 %v379_v2, %v91_v40  ;;  %v95_v48 = vmul.f32 %v374_v1, %v27_v35  ;;  %v39_v22 = vld [vmem:[%s893_s0 + $0xc8] sm:$0xff]  ;;  %v40_v26 = vld [vmem:[%s893_s0 + $0xd0] sm:$0xff]  ;;  %v41_v30 = vld [vmem:[%s893_s0 + $0xd8] sm:$0xff] }
   0xb   :  { %280 = vst [vmem:[%s896_s3 + $0x10] sm:$0xff] %v216_v32  ;;  %v96_v49 = vmul.f32 %v374_v1, %v28_v36  ;;  %v221_v50 = vmax.f32 %v157_v34, 0.0  ;;  %v160_v51 = vadd.f32 %v379_v2, %v92_v43  ;;  %v161_v52 = vadd.f32 %v379_v2, %v93_v44  ;;  %v42_v34 = vld [vmem:[%s893_s0 + $0xe0] sm:$0xff] }
   0xc   :  { %281 = vst [vmem:[%s896_s3 + $0x18] sm:$0xff] %v217_v33  ;;  %v97_v53 = vmul.f32 %v374_v1, %v29_v41  ;;  %v222_v56 = vmax.f32 %v158_v46, 0.0  ;;  %v162_v57 = vadd.f32 %v379_v2, %v94_v45  ;;  %v223_v60 = vmax.f32 %v159_v47, 0.0  ;;  %v45_v46 = vld [vmem:[%s893_s0 + $0xf8] sm:$0xff] }
   0xd   :  { %282 = vst [vmem:[%s896_s3 + $0x20] sm:$0xff] %v218_v37  ;;  %v163_v61 = vadd.f32 %v379_v2, %v95_v48  ;;  %v224_v63 = vmax.f32 %v160_v51, 0.0  ;;  %v164_v0 = vadd.f32 %v379_v2, %v96_v49  ;;  %v98_v3 = vmul.f32 %v374_v1, %v30_v54  ;;  %v47_v54 = vld [vmem:[%s893_s0 + $0x108] sm:$0xff] }
   0xe   :  { %283 = vst [vmem:[%s896_s3 + $0x28] sm:$0xff] %v219_v38  ;;  %v99_v4 = vmul.f32 %v374_v1, %v31_v55  ;;  %v225_v6 = vmax.f32 %v161_v52, 0.0  ;;  %v165_v7 = vadd.f32 %v379_v2, %v97_v53  ;;  %v100_v8 = vmul.f32 %v374_v1, %v32_v58  ;;  %v43_v38 = vld [vmem:[%s893_s0 + $0xe8] sm:$0xff]  ;;  %v48_v58 = vld [vmem:[%s893_s0 + $0x110] sm:$0xff] }
   0xf   :  { %284 = vst [vmem:[%s896_s3 + $0x30] sm:$0xff] %v220_v42  ;;  %v101_v9 = vmul.f32 %v374_v1, %v33_v59  ;;  %v226_v11 = vmax.f32 %v162_v57, 0.0  ;;  %v166_v12 = vadd.f32 %v379_v2, %v98_v3  ;;  %v102_v13 = vmul.f32 %v374_v1, %v34_v62  ;;  %v44_v42 = vld [vmem:[%s893_s0 + $0xf0] sm:$0xff]  ;;  %v49_v62 = vld [vmem:[%s893_s0 + $0x118] sm:$0xff] }
  0x10   :  { %285 = vst [vmem:[%s896_s3 + $0x38] sm:$0xff] %v221_v50  ;;  %v227_v15 = vmax.f32 %v163_v61, 0.0  ;;  %v167_v16 = vadd.f32 %v379_v2, %v99_v4  ;;  %v103_v17 = vmul.f32 %v374_v1, %v35_v5  ;;  %v228_v19 = vmax.f32 %v164_v0, 0.0  ;;  %v46_v50 = vld [vmem:[%s893_s0 + $0x100] sm:$0xff] }
  0x11   :  { %286 = vst [vmem:[%s896_s3 + $0x40] sm:$0xff] %v222_v56  ;;  %v168_v20 = vadd.f32 %v379_v2, %v100_v8  ;;  %v104_v21 = vmul.f32 %v374_v1, %v36_v10  ;;  %v229_v23 = vmax.f32 %v165_v7, 0.0  ;;  %v169_v24 = vadd.f32 %v379_v2, %v101_v9  ;;  %v50_v4 = vld [vmem:[%s893_s0 + $0x120] sm:$0xff]  ;;  %v51_v8 = vld [vmem:[%s893_s0 + $0x128] sm:$0xff] }
  0x12   :  { %287 = vst [vmem:[%s896_s3 + $0x48] sm:$0xff] %v223_v60  ;;  %v105_v25 = vmul.f32 %v374_v1, %v37_v14  ;;  %v230_v27 = vmax.f32 %v166_v12, 0.0  ;;  %v170_v28 = vadd.f32 %v379_v2, %v102_v13  ;;  %v106_v29 = vmul.f32 %v374_v1, %v38_v18  ;;  %v52_v12 = vld [vmem:[%s893_s0 + $0x130] sm:$0xff] }
  0x13   :  { %288 = vst [vmem:[%s896_s3 + $0x50] sm:$0xff] %v224_v63  ;;  %v231_v31 = vmax.f32 %v167_v16, 0.0  ;;  %v171_v32 = vadd.f32 %v379_v2, %v103_v17  ;;  %v107_v33 = vmul.f32 %v374_v1, %v39_v22  ;;  %v232_v35 = vmax.f32 %v168_v20, 0.0  ;;  %v53_v16 = vld [vmem:[%s893_s0 + $0x138] sm:$0xff]  ;;  %v54_v20 = vld [vmem:[%s893_s0 + $0x140] sm:$0xff] }
  0x14   :  { %289 = vst [vmem:[%s896_s3 + $0x58] sm:$0xff] %v225_v6  ;;  %v172_v36 = vadd.f32 %v379_v2, %v104_v21  ;;  %v108_v37 = vmul.f32 %v374_v1, %v40_v26  ;;  %v233_v39 = vmax.f32 %v169_v24, 0.0  ;;  %v173_v40 = vadd.f32 %v379_v2, %v105_v25  ;;  %v55_v24 = vld [vmem:[%s893_s0 + $0x148] sm:$0xff] }
  0x15   :  { %290 = vst [vmem:[%s896_s3 + $0x60] sm:$0xff] %v226_v11  ;;  %v109_v41 = vmul.f32 %v374_v1, %v41_v30  ;;  %v234_v43 = vmax.f32 %v170_v28, 0.0  ;;  %v174_v44 = vadd.f32 %v379_v2, %v106_v29  ;;  %v110_v45 = vmul.f32 %v374_v1, %v42_v34  ;;  %v56_v28 = vld [vmem:[%s893_s0 + $0x150] sm:$0xff] }
  0x16   :  { %291 = vst [vmem:[%s896_s3 + $0x68] sm:$0xff] %v227_v15  ;;  %v235_v47 = vmax.f32 %v171_v32, 0.0  ;;  %v175_v48 = vadd.f32 %v379_v2, %v107_v33  ;;  %v111_v49 = vmul.f32 %v374_v1, %v43_v38  ;;  %v236_v51 = vmax.f32 %v172_v36, 0.0  ;;  %v57_v32 = vld [vmem:[%s893_s0 + $0x158] sm:$0xff]  ;;  %v58_v36 = vld [vmem:[%s893_s0 + $0x160] sm:$0xff] }
  0x17   :  { %292 = vst [vmem:[%s896_s3 + $0x70] sm:$0xff] %v228_v19  ;;  %v176_v52 = vadd.f32 %v379_v2, %v108_v37  ;;  %v112_v53 = vmul.f32 %v374_v1, %v44_v42  ;;  %v237_v55 = vmax.f32 %v173_v40, 0.0  ;;  %v177_v56 = vadd.f32 %v379_v2, %v109_v41  ;;  %v59_v40 = vld [vmem:[%s893_s0 + $0x168] sm:$0xff] }
  0x18   :  { %293 = vst [vmem:[%s896_s3 + $0x78] sm:$0xff] %v229_v23  ;;  %v113_v57 = vmul.f32 %v374_v1, %v45_v46  ;;  %v238_v59 = vmax.f32 %v174_v44, 0.0  ;;  %v178_v60 = vadd.f32 %v379_v2, %v110_v45  ;;  %v114_v61 = vmul.f32 %v374_v1, %v46_v50  ;;  %v60_v44 = vld [vmem:[%s893_s0 + $0x170] sm:$0xff] }
  0x19   :  { %294 = vst [vmem:[%s896_s3 + $0x80] sm:$0xff] %v230_v27  ;;  %v239_v63 = vmax.f32 %v175_v48, 0.0  ;;  %v179_v0 = vadd.f32 %v379_v2, %v111_v49  ;;  %v115_v3 = vmul.f32 %v374_v1, %v47_v54  ;;  %v240_v5 = vmax.f32 %v176_v52, 0.0  ;;  %v61_v48 = vld [vmem:[%s893_s0 + $0x178] sm:$0xff]  ;;  %v62_v52 = vld [vmem:[%s893_s0 + $0x180] sm:$0xff] }
  0x1a   :  { %295 = vst [vmem:[%s896_s3 + $0x88] sm:$0xff] %v231_v31  ;;  %v180_v6 = vadd.f32 %v379_v2, %v112_v53  ;;  %v116_v7 = vmul.f32 %v374_v1, %v48_v58  ;;  %v241_v9 = vmax.f32 %v177_v56, 0.0  ;;  %v181_v10 = vadd.f32 %v379_v2, %v113_v57  ;;  %v63_v56 = vld [vmem:[%s893_s0 + $0x188] sm:$0xff] }
  0x1b   :  { %296 = vst [vmem:[%s896_s3 + $0x90] sm:$0xff] %v232_v35  ;;  %v117_v11 = vmul.f32 %v374_v1, %v49_v62  ;;  %v242_v13 = vmax.f32 %v178_v60, 0.0  ;;  %v182_v14 = vadd.f32 %v379_v2, %v114_v61  ;;  %v118_v15 = vmul.f32 %v374_v1, %v50_v4  ;;  %v64_v60 = vld [vmem:[%s893_s0 + $0x190] sm:$0xff] }
  0x1c   :  { %297 = vst [vmem:[%s896_s3 + $0x98] sm:$0xff] %v233_v39  ;;  %v243_v17 = vmax.f32 %v179_v0, 0.0  ;;  %v183_v18 = vadd.f32 %v379_v2, %v115_v3  ;;  %v119_v19 = vmul.f32 %v374_v1, %v51_v8  ;;  %v244_v21 = vmax.f32 %v180_v6, 0.0  ;;  %v65_v0 = vld [vmem:[%s893_s0 + $0x198] sm:$0xff] }
  0x1d   :  { %298 = vst [vmem:[%s896_s3 + $0xa0] sm:$0xff] %v234_v43  ;;  %v184_v22 = vadd.f32 %v379_v2, %v116_v7  ;;  %v120_v23 = vmul.f32 %v374_v1, %v52_v12  ;;  %v245_v25 = vmax.f32 %v181_v10, 0.0  ;;  %v185_v26 = vadd.f32 %v379_v2, %v117_v11  ;;  %v77_v3 = vld [vmem:[%s893_s0 + $0x1f8] sm:$0xff]  ;;  %v66_v7 = vld [vmem:[%s893_s0 + $0x1a0] sm:$0xff]  ;;  %v67_v11 = vld [vmem:[%s893_s0 + $0x1a8] sm:$0xff] }
  0x1e   :  { %299 = vst [vmem:[%s896_s3 + $0xa8] sm:$0xff] %v235_v47  ;;  %v121_v27 = vmul.f32 %v374_v1, %v53_v16  ;;  %v246_v29 = vmax.f32 %v182_v14, 0.0  ;;  %v186_v30 = vadd.f32 %v379_v2, %v118_v15  ;;  %v122_v31 = vmul.f32 %v374_v1, %v54_v20  ;;  %v68_v15 = vld [vmem:[%s893_s0 + $0x1b0] sm:$0xff]  ;;  %v69_v20 = vld [vmem:[%s893_s0 + $0x1b8] sm:$0xff] }
  0x1f   :  { %300 = vst [vmem:[%s896_s3 + $0xb0] sm:$0xff] %v236_v51  ;;  %v247_v33 = vmax.f32 %v183_v18, 0.0  ;;  %v187_v34 = vadd.f32 %v379_v2, %v119_v19  ;;  %v123_v35 = vmul.f32 %v374_v1, %v55_v24  ;;  %v248_v37 = vmax.f32 %v184_v22, 0.0  ;;  %v70_v24 = vld [vmem:[%s893_s0 + $0x1c0] sm:$0xff] }
  0x20   :  { %301 = vst [vmem:[%s896_s3 + $0xb8] sm:$0xff] %v237_v55  ;;  %v188_v38 = vadd.f32 %v379_v2, %v120_v23  ;;  %v124_v39 = vmul.f32 %v374_v1, %v56_v28  ;;  %v249_v41 = vmax.f32 %v185_v26, 0.0  ;;  %v189_v42 = vadd.f32 %v379_v2, %v121_v27 }
  0x21   :  { %302 = vst [vmem:[%s896_s3 + $0xc0] sm:$0xff] %v238_v59  ;;  %v125_v43 = vmul.f32 %v374_v1, %v57_v32  ;;  %v250_v45 = vmax.f32 %v186_v30, 0.0  ;;  %v190_v46 = vadd.f32 %v379_v2, %v122_v31  ;;  %v126_v47 = vmul.f32 %v374_v1, %v58_v36 }
  0x22   :  { %303 = vst [vmem:[%s896_s3 + $0xc8] sm:$0xff] %v239_v63  ;;  %v251_v49 = vmax.f32 %v187_v34, 0.0  ;;  %v191_v50 = vadd.f32 %v379_v2, %v123_v35  ;;  %v127_v51 = vmul.f32 %v374_v1, %v59_v40  ;;  %v252_v53 = vmax.f32 %v188_v38, 0.0 }
  0x23   :  { %304 = vst [vmem:[%s896_s3 + $0xd0] sm:$0xff] %v240_v5  ;;  %v192_v54 = vadd.f32 %v379_v2, %v124_v39  ;;  %v128_v55 = vmul.f32 %v374_v1, %v60_v44  ;;  %v253_v57 = vmax.f32 %v189_v42, 0.0  ;;  %v193_v58 = vadd.f32 %v379_v2, %v125_v43 }
  0x24   :  { %305 = vst [vmem:[%s896_s3 + $0xd8] sm:$0xff] %v241_v9  ;;  %v129_v59 = vmul.f32 %v374_v1, %v61_v48  ;;  %v254_v61 = vmax.f32 %v190_v46, 0.0  ;;  %v194_v62 = vadd.f32 %v379_v2, %v126_v47  ;;  %v130_v63 = vmul.f32 %v374_v1, %v62_v52 }
  0x25   :  { %306 = vst [vmem:[%s896_s3 + $0xe0] sm:$0xff] %v242_v13  ;;  %v255_v4 = vmax.f32 %v191_v50, 0.0  ;;  %v195_v5 = vadd.f32 %v379_v2, %v127_v51  ;;  %v131_v6 = vmul.f32 %v374_v1, %v63_v56  ;;  %v256_v8 = vmax.f32 %v192_v54, 0.0 }
  0x26   :  { %307 = vst [vmem:[%s896_s3 + $0xe8] sm:$0xff] %v243_v17  ;;  %v196_v9 = vadd.f32 %v379_v2, %v128_v55  ;;  %v132_v10 = vmul.f32 %v374_v1, %v64_v60  ;;  %v257_v12 = vmax.f32 %v193_v58, 0.0  ;;  %v197_v13 = vadd.f32 %v379_v2, %v129_v59 }
  0x27   :  { %308 = vst [vmem:[%s896_s3 + $0xf0] sm:$0xff] %v244_v21  ;;  %v133_v14 = vmul.f32 %v374_v1, %v65_v0  ;;  %v145_v16 = vmul.f32 %v374_v1, %v77_v3  ;;  %v258_v17 = vmax.f32 %v194_v62, 0.0  ;;  %v198_v18 = vadd.f32 %v379_v2, %v130_v63 }
  0x28   :  { %309 = vst [vmem:[%s896_s3 + $0xf8] sm:$0xff] %v245_v25  ;;  %v134_v19 = vmul.f32 %v374_v1, %v66_v7  ;;  %v259_v21 = vmax.f32 %v195_v5, 0.0  ;;  %v199_v22 = vadd.f32 %v379_v2, %v131_v6  ;;  %v135_v23 = vmul.f32 %v374_v1, %v67_v11 }
  0x29   :  { %310 = vst [vmem:[%s896_s3 + $0x100] sm:$0xff] %v246_v29  ;;  %v784_v25 = vadd.f32 %v379_v2, %v145_v16  ;;  %v260_v26 = vmax.f32 %v196_v9, 0.0  ;;  %v200_v27 = vadd.f32 %v379_v2, %v132_v10  ;;  %v136_v28 = vmul.f32 %v374_v1, %v68_v15  ;;  %v71_v29 = vld [vmem:[%s893_s0 + $0x1c8] sm:$0xff] }
  0x2a   :  { %311 = vst [vmem:[%s896_s3 + $0x108] sm:$0xff] %v247_v33  ;;  %v261_v30 = vmax.f32 %v197_v13, 0.0  ;;  %v201_v31 = vadd.f32 %v379_v2, %v133_v14  ;;  %v137_v32 = vmul.f32 %v374_v1, %v69_v20  ;;  %v72_v33 = vld [vmem:[%s893_s0 + $0x1d0] sm:$0xff]  ;;  %v262_v34 = vmax.f32 %v198_v18, 0.0 }
  0x2b   :  { %312 = vst [vmem:[%s896_s3 + $0x110] sm:$0xff] %v248_v37  ;;  %v202_v35 = vadd.f32 %v379_v2, %v134_v19  ;;  %v138_v36 = vmul.f32 %v374_v1, %v70_v24  ;;  %v73_v37 = vld [vmem:[%s893_s0 + $0x1d8] sm:$0xff]  ;;  %v263_v38 = vmax.f32 %v199_v22, 0.0  ;;  %v203_v39 = vadd.f32 %v379_v2, %v135_v23 }
  0x2c   :  { %313 = vst [vmem:[%s896_s3 + $0x118] sm:$0xff] %v249_v41  ;;  %v139_v40 = vmul.f32 %v374_v1, %v71_v29  ;;  %v74_v41 = vld [vmem:[%s893_s0 + $0x1e0] sm:$0xff]  ;;  %v264_v42 = vmax.f32 %v200_v27, 0.0  ;;  %v204_v43 = vadd.f32 %v379_v2, %v136_v28  ;;  %v140_v44 = vmul.f32 %v374_v1, %v72_v33 }
  0x2d   :  { %314 = vst [vmem:[%s896_s3 + $0x120] sm:$0xff] %v250_v45  ;;  %v75_v45 = vld [vmem:[%s893_s0 + $0x1e8] sm:$0xff]  ;;  %v265_v46 = vmax.f32 %v201_v31, 0.0  ;;  %v205_v47 = vadd.f32 %v379_v2, %v137_v32  ;;  %v141_v48 = vmul.f32 %v374_v1, %v73_v37  ;;  %v266_v50 = vmax.f32 %v202_v35, 0.0 }
  0x2e   :  { %315 = vst [vmem:[%s896_s3 + $0x128] sm:$0xff] %v251_v49  ;;  %v76_v49 = vld [vmem:[%s893_s0 + $0x1f0] sm:$0xff]  ;;  %v206_v51 = vadd.f32 %v379_v2, %v138_v36  ;;  %v142_v52 = vmul.f32 %v374_v1, %v74_v41  ;;  %v207_v54 = vadd.f32 %v379_v2, %v139_v40  ;;  %v143_v55 = vmul.f32 %v374_v1, %v75_v45 }
  0x2f   :  { %316 = vst [vmem:[%s896_s3 + $0x130] sm:$0xff] %v252_v53  ;;  %v267_v53 = vmax.f32 %v203_v39, 0.0  ;;  %v268_v56 = vmax.f32 %v204_v43, 0.0  ;;  %v144_v58 = vmul.f32 %v374_v1, %v76_v49  ;;  %v269_v59 = vmax.f32 %v205_v47, 0.0 }
  0x30   :  { %317 = vst [vmem:[%s896_s3 + $0x138] sm:$0xff] %v253_v57  ;;  %v208_v57 = vadd.f32 %v379_v2, %v140_v44  ;;  %v209_v60 = vadd.f32 %v379_v2, %v141_v48  ;;  %v210_v62 = vadd.f32 %v379_v2, %v142_v52  ;;  %v271_v63 = vmax.f32 %v207_v54, 0.0 }
  0x31   :  { %318 = vst [vmem:[%s896_s3 + $0x140] sm:$0xff] %v254_v61  ;;  %v270_v61 = vmax.f32 %v206_v51, 0.0  ;;  %v211_v1 = vadd.f32 %v379_v2, %v143_v55  ;;  %v212_v3 = vadd.f32 %v379_v2, %v144_v58  ;;  %v277_v7 = vmax.f32 %v784_v25, 0.0 }
  0x32   :  { %319 = vst [vmem:[%s896_s3 + $0x148] sm:$0xff] %v255_v4  ;;  %v272_v0 = vmax.f32 %v208_v57, 0.0  ;;  %v273_v4 = vmax.f32 %v209_v60, 0.0  ;;  %v274_v5 = vmax.f32 %v210_v62, 0.0 }
  0x33   :  { %320 = vst [vmem:[%s896_s3 + $0x150] sm:$0xff] %v256_v8  ;;  %v275_v6 = vmax.f32 %v211_v1, 0.0  ;;  %v276_v2 = vmax.f32 %v212_v3, 0.0 }
  0x34   :  { %321 = vst [vmem:[%s896_s3 + $0x158] sm:$0xff] %v257_v12 }
  0x35   :  { %322 = vst [vmem:[%s896_s3 + $0x160] sm:$0xff] %v258_v17 }
  0x36   :  { %323 = vst [vmem:[%s896_s3 + $0x168] sm:$0xff] %v259_v21 }
  0x37   :  { %324 = vst [vmem:[%s896_s3 + $0x170] sm:$0xff] %v260_v26 }
  0x38   :  { %325 = vst [vmem:[%s896_s3 + $0x178] sm:$0xff] %v261_v30 }
  0x39   :  { %326 = vst [vmem:[%s896_s3 + $0x180] sm:$0xff] %v262_v34 }
  0x3a   :  { %327 = vst [vmem:[%s896_s3 + $0x188] sm:$0xff] %v263_v38 }
  0x3b   :  { %328 = vst [vmem:[%s896_s3 + $0x190] sm:$0xff] %v264_v42 }
  0x3c   :  { %329 = vst [vmem:[%s896_s3 + $0x198] sm:$0xff] %v265_v46 }
  0x3d   :  { %330 = vst [vmem:[%s896_s3 + $0x1a0] sm:$0xff] %v266_v50 }
  0x3e   :  { %331 = vst [vmem:[%s896_s3 + $0x1a8] sm:$0xff] %v267_v53 }
  0x3f   :  { %332 = vst [vmem:[%s896_s3 + $0x1b0] sm:$0xff] %v268_v56 }
  0x40   :  { %333 = vst [vmem:[%s896_s3 + $0x1b8] sm:$0xff] %v269_v59 }
  0x41   :  { %334 = vst [vmem:[%s896_s3 + $0x1c0] sm:$0xff] %v270_v61 }
  0x42   :  { %335 = vst [vmem:[%s896_s3 + $0x1c8] sm:$0xff] %v271_v63 }
  0x43   :  { %336 = vst [vmem:[%s896_s3 + $0x1d0] sm:$0xff] %v272_v0 }
  0x44   :  { %337 = vst [vmem:[%s896_s3 + $0x1d8] sm:$0xff] %v273_v4 }
  0x45   :  { %338 = vst [vmem:[%s896_s3 + $0x1e0] sm:$0xff] %v274_v5 }
  0x46   :  { %339 = vst [vmem:[%s896_s3 + $0x1e8] sm:$0xff] %v275_v6 }
  0x47   :  { %340 = vst [vmem:[%s896_s3 + $0x1f0] sm:$0xff] %v276_v2 }
  0x48   :  { %341 = vst [vmem:[%s896_s3 + $0x1f8] sm:$0xff] %v277_v7 }

// kernel: aspp_forward.2
= control target key start
LH: loop header
LB: loop body
LE: loop exit
PB: predicated region body
PF: predicated region fallthrough
CT: control target
= control target key end

     0   :  { %vm999_vm0 = vcmask 1040384   ;;  %vm1001_vm1 = vcmask 1041408   ;;  %s1719_s1 = inlined_call_operand.vmem [shape: f32[128,128], index: 1, kind: input, shape index: {}]   ;;  %s1720_s0 = inlined_call_operand.vmem [shape: f32[512,128], index: 0, kind: input, shape index: {}]   ;;  %s1721_s2 = inlined_call_operand.vmem [shape: f32[512,128], index: 2, kind: output, shape index: {0}]   ;;  %s1722_s3 = inlined_call_operand.vmem [shape: f32[8,128], index: 3, kind: output, shape index: {1}]  }
   0x1   :  { %v98_v0 = vld [vmem:[%s1719_s1 + $0x78] sm:$0xff]  ;;  %v97_v1 = vld [vmem:[%s1719_s1 + $0x70] sm:$0xff]  ;;  %v96_v2 = vld [vmem:[%s1719_s1 + $0x68] sm:$0xff] }
   0x2   :  { %227 = vmatpush.msra.mxu0 %v98_v0  ;;  %1012 = vmatpush.msra.mxu1 %v98_v0  ;;  %v95_v3 = vld [vmem:[%s1719_s1 + $0x60] sm:$0xff]  ;;  %v94_v4 = vld [vmem:[%s1719_s1 + $0x58] sm:$0xff]  ;;  %v93_v5 = vld [vmem:[%s1719_s1 + $0x50] sm:$0xff] }
   0x3   :  { %1013 = vmatpush.msra.mxu2 %v98_v0  ;;  %1014 = vmatpush.msra.mxu3 %v98_v0  ;;  %v92_v6 = vld [vmem:[%s1719_s1 + $0x48] sm:$0xff]  ;;  %v91_v7 = vld [vmem:[%s1719_s1 + $0x40] sm:$0xff]  ;;  %v90_v8 = vld [vmem:[%s1719_s1 + $0x38] sm:$0xff] }
   0x4   :  { %228 = vmatpush.msra.mxu0 %v97_v1  ;;  %1015 = vmatpush.msra.mxu1 %v97_v1  ;;  %v89_v9 = vld [vmem:[%s1719_s1 + $0x30] sm:$0xff]  ;;  %v88_v10 = vld [vmem:[%s1719_s1 + $0x28] sm:$0xff]  ;;  %v87_v11 = vld [vmem:[%s1719_s1 + $0x20] sm:$0xff] }
   0x5   :  { %1016 = vmatpush.msra.mxu2 %v97_v1  ;;  %1017 = vmatpush.msra.mxu3 %v97_v1  ;;  %v86_v12 = vld [vmem:[%s1719_s1 + $0x18] sm:$0xff]  ;;  %v85_v13 = vld [vmem:[%s1719_s1 + $0x10] sm:$0xff]  ;;  %v84_v14 = vld [vmem:[%s1719_s1 + $0x8] sm:$0xff] }
   0x6   :  { %229 = vmatpush.msra.mxu0 %v96_v2  ;;  %1018 = vmatpush.msra.mxu1 %v96_v2  ;;  %v83_v15 = vld [vmem:[%s1719_s1] sm:$0xff]  ;;  %v164_v20 = vld [vmem:[%s1720_s0 + $0x8] sm:$0xff]  ;;  %v165_v24 = vld [vmem:[%s1720_s0 + $0x10] sm:$0xff] }
   0x7   :  { %1019 = vmatpush.msra.mxu2 %v96_v2  ;;  %1020 = vmatpush.msra.mxu3 %v96_v2  ;;  %v163_v16 = vld [vmem:[%s1720_s0] sm:$0xff]  ;;  %v180_v21 = vld [vmem:[%s1720_s0 + $0x88] sm:$0xff]  ;;  %v181_v25 = vld [vmem:[%s1720_s0 + $0x90] sm:$0xff] }
   0x8   :  { %230 = vmatpush.msra.mxu0 %v95_v3  ;;  %1021 = vmatpush.msra.mxu1 %v95_v3  ;;  %v179_v17 = vld [vmem:[%s1720_s0 + $0x80] sm:$0xff]  ;;  %v196_v22 = vld [vmem:[%s1720_s0 + $0x108] sm:$0xff]  ;;  %v197_v26 = vld [vmem:[%s1720_s0 + $0x110] sm:$0xff] }
   0x9   :  { %1022 = vmatpush.msra.mxu2 %v95_v3  ;;  %1023 = vmatpush.msra.mxu3 %v95_v3  ;;  %v195_v18 = vld [vmem:[%s1720_s0 + $0x100] sm:$0xff]  ;;  %v212_v23 = vld [vmem:[%s1720_s0 + $0x188] sm:$0xff]  ;;  %v213_v27 = vld [vmem:[%s1720_s0 + $0x190] sm:$0xff] }
   0xa   :  { %231 = vmatpush.msra.mxu0 %v94_v4  ;;  %1024 = vmatpush.msra.mxu1 %v94_v4  ;;  %v211_v19 = vld [vmem:[%s1720_s0 + $0x180] sm:$0xff]  ;;  %v166_v28 = vld [vmem:[%s1720_s0 + $0x18] sm:$0xff]  ;;  %v168_v36 = vld [vmem:[%s1720_s0 + $0x28] sm:$0xff] }
   0xb   :  { %1025 = vmatpush.msra.mxu2 %v94_v4  ;;  %1026 = vmatpush.msra.mxu3 %v94_v4  ;;  %v182_v29 = vld [vmem:[%s1720_s0 + $0x98] sm:$0xff]  ;;  %v167_v32 = vld [vmem:[%s1720_s0 + $0x20] sm:$0xff]  ;;  %v184_v37 = vld [vmem:[%s1720_s0 + $0xa8] sm:$0xff] }
   0xc   :  { %232 = vmatpush.msra.mxu0 %v93_v5  ;;  %1027 = vmatpush.msra.mxu1 %v93_v5  ;;  %v198_v30 = vld [vmem:[%s1720_s0 + $0x118] sm:$0xff]  ;;  %v183_v33 = vld [vmem:[%s1720_s0 + $0xa0] sm:$0xff]  ;;  %v200_v38 = vld [vmem:[%s1720_s0 + $0x128] sm:$0xff] }
   0xd   :  { %1028 = vmatpush.msra.mxu2 %v93_v5  ;;  %1029 = vmatpush.msra.mxu3 %v93_v5  ;;  %v214_v31 = vld [vmem:[%s1720_s0 + $0x198] sm:$0xff]  ;;  %v199_v34 = vld [vmem:[%s1720_s0 + $0x120] sm:$0xff]  ;;  %v216_v39 = vld [vmem:[%s1720_s0 + $0x1a8] sm:$0xff] }
   0xe   :  { %233 = vmatpush.msra.mxu0 %v92_v6  ;;  %1030 = vmatpush.msra.mxu1 %v92_v6  ;;  %v215_v35 = vld [vmem:[%s1720_s0 + $0x1a0] sm:$0xff]  ;;  %v169_v40 = vld [vmem:[%s1720_s0 + $0x30] sm:$0xff]  ;;  %v170_v44 = vld [vmem:[%s1720_s0 + $0x38] sm:$0xff] }
   0xf   :  { %1031 = vmatpush.msra.mxu2 %v92_v6  ;;  %1032 = vmatpush.msra.mxu3 %v92_v6  ;;  %v185_v41 = vld [vmem:[%s1720_s0 + $0xb0] sm:$0xff]  ;;  %v186_v45 = vld [vmem:[%s1720_s0 + $0xb8] sm:$0xff]  ;;  %v171_v48 = vld [vmem:[%s1720_s0 + $0x40] sm:$0xff] }
  0x10   :  { %234 = vmatpush.msra.mxu0 %v91_v7  ;;  %1033 = vmatpush.msra.mxu1 %v91_v7  ;;  %v201_v42 = vld [vmem:[%s1720_s0 + $0x130] sm:$0xff]  ;;  %v202_v46 = vld [vmem:[%s1720_s0 + $0x138] sm:$0xff]  ;;  %v187_v49 = vld [vmem:[%s1720_s0 + $0xc0] sm:$0xff] }
  0x11   :  { %1034 = vmatpush.msra.mxu2 %v91_v7  ;;  %1035 = vmatpush.msra.mxu3 %v91_v7  ;;  %v217_v43 = vld [vmem:[%s1720_s0 + $0x1b0] sm:$0xff]  ;;  %v218_v47 = vld [vmem:[%s1720_s0 + $0x1b8] sm:$0xff]  ;;  %v203_v50 = vld [vmem:[%s1720_s0 + $0x140] sm:$0xff] }
  0x12   :  { %235 = vmatpush.msra.mxu0 %v90_v8  ;;  %1036 = vmatpush.msra.mxu1 %v90_v8  ;;  %v219_v51 = vld [vmem:[%s1720_s0 + $0x1c0] sm:$0xff]  ;;  %v172_v52 = vld [vmem:[%s1720_s0 + $0x48] sm:$0xff]  ;;  %v173_v56 = vld [vmem:[%s1720_s0 + $0x50] sm:$0xff] }
  0x13   :  { %1037 = vmatpush.msra.mxu2 %v90_v8  ;;  %1038 = vmatpush.msra.mxu3 %v90_v8  ;;  %v188_v53 = vld [vmem:[%s1720_s0 + $0xc8] sm:$0xff]  ;;  %v189_v57 = vld [vmem:[%s1720_s0 + $0xd0] sm:$0xff]  ;;  %v174_v60 = vld [vmem:[%s1720_s0 + $0x58] sm:$0xff] }
  0x14   :  { %236 = vmatpush.msra.mxu0 %v89_v9  ;;  %1039 = vmatpush.msra.mxu1 %v89_v9  ;;  %v204_v54 = vld [vmem:[%s1720_s0 + $0x148] sm:$0xff]  ;;  %v205_v58 = vld [vmem:[%s1720_s0 + $0x150] sm:$0xff]  ;;  %v190_v61 = vld [vmem:[%s1720_s0 + $0xd8] sm:$0xff] }
  0x15   :  { %1040 = vmatpush.msra.mxu2 %v89_v9  ;;  %1041 = vmatpush.msra.mxu3 %v89_v9  ;;  %v220_v55 = vld [vmem:[%s1720_s0 + $0x1c8] sm:$0xff]  ;;  %v221_v59 = vld [vmem:[%s1720_s0 + $0x1d0] sm:$0xff]  ;;  %v206_v62 = vld [vmem:[%s1720_s0 + $0x158] sm:$0xff] }
  0x16   :  { %237 = vmatpush.msra.mxu0 %v88_v10  ;;  %1042 = vmatpush.msra.mxu1 %v88_v10  ;;  %v222_v63 = vld [vmem:[%s1720_s0 + $0x1d8] sm:$0xff]  ;;  %v175_v0 = vld [vmem:[%s1720_s0 + $0x60] sm:$0xff]  ;;  %v176_v4 = vld [vmem:[%s1720_s0 + $0x68] sm:$0xff] }
  0x17   :  { %1043 = vmatpush.msra.mxu2 %v88_v10  ;;  %1044 = vmatpush.msra.mxu3 %v88_v10  ;;  %v191_v1 = vld [vmem:[%s1720_s0 + $0xe0] sm:$0xff]  ;;  %v192_v5 = vld [vmem:[%s1720_s0 + $0xe8] sm:$0xff]  ;;  %v177_v8 = vld [vmem:[%s1720_s0 + $0x70] sm:$0xff] }
  0x18   :  { %238 = vmatpush.msra.mxu0 %v87_v11  ;;  %1045 = vmatpush.msra.mxu1 %v87_v11  ;;  %v207_v2 = vld [vmem:[%s1720_s0 + $0x160] sm:$0xff]  ;;  %v208_v6 = vld [vmem:[%s1720_s0 + $0x168] sm:$0xff]  ;;  %v193_v9 = vld [vmem:[%s1720_s0 + $0xf0] sm:$0xff] }
  0x19   :  { %1046 = vmatpush.msra.mxu2 %v87_v11  ;;  %1047 = vmatpush.msra.mxu3 %v87_v11  ;;  %v223_v3 = vld [vmem:[%s1720_s0 + $0x1e0] sm:$0xff]  ;;  %v224_v7 = vld [vmem:[%s1720_s0 + $0x1e8] sm:$0xff]  ;;  %v209_v10 = vld [vmem:[%s1720_s0 + $0x170] sm:$0xff] }
  0x1a   :  { %239 = vmatpush.msra.mxu0 %v86_v12  ;;  %1048 = vmatpush.msra.mxu1 %v86_v12  ;;  %v225_v11 = vld [vmem:[%s1720_s0 + $0x1f0] sm:$0xff] }
  0x1b   :  { %1049 = vmatpush.msra.mxu2 %v86_v12  ;;  %1050 = vmatpush.msra.mxu3 %v86_v12  ;;  %v178_v12 = vld [vmem:[%s1720_s0 + $0x78] sm:$0xff] }
  0x1c   :  { %240 = vmatpush.msra.mxu0 %v85_v13  ;;  %1051 = vmatpush.msra.mxu1 %v85_v13 }
  0x1d   :  { %1052 = vmatpush.msra.mxu2 %v85_v13  ;;  %1053 = vmatpush.msra.mxu3 %v85_v13  ;;  %v194_v13 = vld [vmem:[%s1720_s0 + $0xf8] sm:$0xff] }
  0x1e   :  { %241 = vmatpush.msra.mxu0 %v84_v14  ;;  %1054 = vmatpush.msra.mxu1 %v84_v14 }
  0x1f   :  { %1055 = vmatpush.msra.mxu2 %v84_v14  ;;  %1056 = vmatpush.msra.mxu3 %v84_v14  ;;  %v210_v14 = vld [vmem:[%s1720_s0 + $0x178] sm:$0xff] }
  0x20   :  { %242 = vmatpush.msra.mxu0 %v83_v15  ;;  %1057 = vmatpush.msra.mxu1 %v83_v15 }
  0x21   :  { %1058 = vmatpush.msra.mxu2 %v83_v15  ;;  %1059 = vmatpush.msra.mxu3 %v83_v15  ;;  %v226_v15 = vld [vmem:[%s1720_s0 + $0x1f8] sm:$0xff] }
  0x22   :  { %243 = vmatmul.f32.vlgmr.msra.gmra.mxu0 %v163_v16  ;;  %291 = vmatmul.f32.vlgmr.msra.gmra.mxu1 %v179_v17 }
  0x23   :  { %339 = vmatmul.f32.vlgmr.msra.gmra.mxu2 %v195_v18  ;;  %387 = vmatmul.f32.vlgmr.msra.gmra.mxu3 %v211_v19 }
  0x2a   :  { %246 = vmatmul.f32.gmra.mxu0 %v164_v20  ;;  %294 = vmatmul.f32.gmra.mxu1 %v180_v21 }
  0x2b   :  { %342 = vmatmul.f32.gmra.mxu2 %v196_v22  ;;  %390 = vmatmul.f32.gmra.mxu3 %v212_v23 }
  0x32   :  { %249 = vmatmul.f32.gmra.mxu0 %v165_v24  ;;  %297 = vmatmul.f32.gmra.mxu1 %v181_v25 }
  0x33   :  { %345 = vmatmul.f32.gmra.mxu2 %v197_v26  ;;  %393 = vmatmul.f32.gmra.mxu3 %v213_v27 }
  0x3a   :  { %252 = vmatmul.f32.gmra.mxu0 %v166_v28  ;;  %300 = vmatmul.f32.gmra.mxu1 %v182_v29 }
  0x3b   :  { %348 = vmatmul.f32.gmra.mxu2 %v198_v30  ;;  %396 = vmatmul.f32.gmra.mxu3 %v214_v31 }
  0x42   :  { %255 = vmatmul.f32.gmra.mxu0 %v167_v32  ;;  %303 = vmatmul.f32.gmra.mxu1 %v183_v33 }
  0x43   :  { %351 = vmatmul.f32.gmra.mxu2 %v199_v34  ;;  %399 = vmatmul.f32.gmra.mxu3 %v215_v35 }
  0x4a   :  { %258 = vmatmul.f32.gmra.mxu0 %v168_v36  ;;  %306 = vmatmul.f32.gmra.mxu1 %v184_v37 }
  0x4b   :  { %354 = vmatmul.f32.gmra.mxu2 %v200_v38  ;;  %402 = vmatmul.f32.gmra.mxu3 %v216_v39 }
  0x52   :  { %261 = vmatmul.f32.gmra.mxu0 %v169_v40  ;;  %309 = vmatmul.f32.gmra.mxu1 %v185_v41 }
  0x53   :  { %357 = vmatmul.f32.gmra.mxu2 %v201_v42  ;;  %405 = vmatmul.f32.gmra.mxu3 %v217_v43 }
  0x5a   :  { %264 = vmatmul.f32.gmra.mxu0 %v170_v44  ;;  %312 = vmatmul.f32.gmra.mxu1 %v186_v45 }
  0x5b   :  { %360 = vmatmul.f32.gmra.mxu2 %v202_v46  ;;  %408 = vmatmul.f32.gmra.mxu3 %v218_v47 }
  0x62   :  { %267 = vmatmul.f32.gmra.mxu0 %v171_v48  ;;  %315 = vmatmul.f32.gmra.mxu1 %v187_v49 }
  0x63   :  { %363 = vmatmul.f32.gmra.mxu2 %v203_v50  ;;  %411 = vmatmul.f32.gmra.mxu3 %v219_v51 }
  0x6a   :  { %270 = vmatmul.f32.gmra.mxu0 %v172_v52  ;;  %318 = vmatmul.f32.gmra.mxu1 %v188_v53 }
  0x6b   :  { %366 = vmatmul.f32.gmra.mxu2 %v204_v54  ;;  %414 = vmatmul.f32.gmra.mxu3 %v220_v55 }
  0x72   :  { %273 = vmatmul.f32.gmra.mxu0 %v173_v56  ;;  %321 = vmatmul.f32.gmra.mxu1 %v189_v57 }
  0x73   :  { %369 = vmatmul.f32.gmra.mxu2 %v205_v58  ;;  %417 = vmatmul.f32.gmra.mxu3 %v221_v59 }
  0x7a   :  { %276 = vmatmul.f32.gmra.mxu0 %v174_v60  ;;  %324 = vmatmul.f32.gmra.mxu1 %v190_v61 }
  0x7b   :  { %372 = vmatmul.f32.gmra.mxu2 %v206_v62  ;;  %420 = vmatmul.f32.gmra.mxu3 %v222_v63 }
  0x82   :  { %279 = vmatmul.f32.gmra.mxu0 %v175_v0  ;;  %327 = vmatmul.f32.gmra.mxu1 %v191_v1 }
  0x83   :  { %375 = vmatmul.f32.gmra.mxu2 %v207_v2  ;;  %423 = vmatmul.f32.gmra.mxu3 %v223_v3 }
  0x8a   :  { %282 = vmatmul.f32.gmra.mxu0 %v176_v4  ;;  %330 = vmatmul.f32.gmra.mxu1 %v192_v5 }
  0x8b   :  { %378 = vmatmul.f32.gmra.mxu2 %v208_v6  ;;  %426 = vmatmul.f32.gmra.mxu3 %v224_v7 }
  0x92   :  { %285 = vmatmul.f32.gmra.mxu0 %v177_v8  ;;  %333 = vmatmul.f32.gmra.mxu1 %v193_v9 }
  0x93   :  { %381 = vmatmul.f32.gmra.mxu2 %v209_v10  ;;  %429 = vmatmul.f32.gmra.mxu3 %v225_v11 }
  0x9a   :  { %288 = vmatmul.f32.gmra.mxu0 %v178_v12  ;;  %336 = vmatmul.f32.gmra.mxu1 %v194_v13 }
  0x9b   :  { %384 = vmatmul.f32.gmra.mxu2 %v210_v14  ;;  %432 = vmatmul.f32.gmra.mxu3 %v226_v15 }
  0x9f   :  { %v244_v16 = vpop.f32.mrf.mxu0  ;;  %v292_v17 = vpop.f32.mrf.mxu1 }
  0xa0   :  { %631 = vst [vmem:[%s1721_s2] sm:$0xff] %v244_v16  ;;  %v733_v20 = vmul.f32 %v244_v16, %v244_v16  ;;  %v809_v21 = vmul.f32 %v292_v17, %v292_v17 }
  0xa1   :  { %647 = vst [vmem:[%s1721_s2 + $0x80] sm:$0xff] %v292_v17 }
  0xa6   :  { %v340_v18 = vpop.f32.mrf.mxu2  ;;  %v388_v19 = vpop.f32.mrf.mxu3 }
  0xa7   :  { %663 = vst [vmem:[%s1721_s2 + $0x100] sm:$0xff] %v340_v18  ;;  %v247_v22 = vpop.f32.mrf.mxu0  ;;  %v295_v23 = vpop.f32.mrf.mxu1  ;;  %v885_v30 = vmul.f32 %v340_v18, %v340_v18  ;;  %v961_v31 = vmul.f32 %v388_v19, %v388_v19 }
  0xa8   :  { %679 = vst [vmem:[%s1721_s2 + $0x180] sm:$0xff] %v388_v19  ;;  %v711_v24 = vadd.f32 %v247_v22, %v244_v16  ;;  %v734_v25 = vmul.f32 %v247_v22, %v247_v22  ;;  %v787_v26 = vadd.f32 %v295_v23, %v292_v17  ;;  %v810_v27 = vmul.f32 %v295_v23, %v295_v23 }
  0xa9   :  { %632 = vst [vmem:[%s1721_s2 + $0x8] sm:$0xff] %v247_v22 }
  0xaa   :  { %v749_v28 = vadd.f32 %v734_v25, %v733_v20  ;;  %648 = vst [vmem:[%s1721_s2 + $0x88] sm:$0xff] %v295_v23  ;;  %v825_v29 = vadd.f32 %v810_v27, %v809_v21 }
  0xae   :  { %v343_v32 = vpop.f32.mrf.mxu2  ;;  %v391_v33 = vpop.f32.mrf.mxu3 }
  0xaf   :  { %664 = vst [vmem:[%s1721_s2 + $0x108] sm:$0xff] %v343_v32  ;;  %v863_v34 = vadd.f32 %v343_v32, %v340_v18  ;;  %v886_v35 = vmul.f32 %v343_v32, %v343_v32  ;;  %v939_v36 = vadd.f32 %v391_v33, %v388_v19  ;;  %v962_v37 = vmul.f32 %v391_v33, %v391_v33  ;;  %v250_v38 = vpop.f32.mrf.mxu0  ;;  %v298_v39 = vpop.f32.mrf.mxu1 }
  0xb0   :  { %680 = vst [vmem:[%s1721_s2 + $0x188] sm:$0xff] %v391_v33  ;;  %v712_v40 = vadd.f32 %v711_v24, %v250_v38  ;;  %v735_v41 = vmul.f32 %v250_v38, %v250_v38  ;;  %v788_v42 = vadd.f32 %v787_v26, %v298_v39  ;;  %v811_v43 = vmul.f32 %v298_v39, %v298_v39 }
  0xb1   :  { %v901_v44 = vadd.f32 %v886_v35, %v885_v30  ;;  %v977_v45 = vadd.f32 %v962_v37, %v961_v31  ;;  %633 = vst [vmem:[%s1721_s2 + $0x10] sm:$0xff] %v250_v38 }
  0xb2   :  { %v750_v46 = vadd.f32 %v749_v28, %v735_v41  ;;  %649 = vst [vmem:[%s1721_s2 + $0x90] sm:$0xff] %v298_v39  ;;  %v826_v47 = vadd.f32 %v825_v29, %v811_v43 }
  0xb6   :  { %v346_v48 = vpop.f32.mrf.mxu2  ;;  %v394_v49 = vpop.f32.mrf.mxu3 }
  0xb7   :  { %665 = vst [vmem:[%s1721_s2 + $0x110] sm:$0xff] %v346_v48  ;;  %v864_v50 = vadd.f32 %v863_v34, %v346_v48  ;;  %v887_v51 = vmul.f32 %v346_v48, %v346_v48  ;;  %v940_v52 = vadd.f32 %v939_v36, %v394_v49  ;;  %v963_v53 = vmul.f32 %v394_v49, %v394_v49  ;;  %v253_v54 = vpop.f32.mrf.mxu0  ;;  %v301_v55 = vpop.f32.mrf.mxu1 }
  0xb8   :  { %681 = vst [vmem:[%s1721_s2 + $0x190] sm:$0xff] %v394_v49  ;;  %v713_v56 = vadd.f32 %v712_v40, %v253_v54  ;;  %v736_v57 = vmul.f32 %v253_v54, %v253_v54  ;;  %v789_v58 = vadd.f32 %v788_v42, %v301_v55  ;;  %v812_v59 = vmul.f32 %v301_v55, %v301_v55 }
  0xb9   :  { %v902_v60 = vadd.f32 %v901_v44, %v887_v51  ;;  %v978_v61 = vadd.f32 %v977_v45, %v963_v53  ;;  %634 = vst [vmem:[%s1721_s2 + $0x18] sm:$0xff] %v253_v54 }
  0xba   :  { %v751_v62 = vadd.f32 %v750_v46, %v736_v57  ;;  %650 = vst [vmem:[%s1721_s2 + $0x98] sm:$0xff] %v301_v55  ;;  %v827_v63 = vadd.f32 %v826_v47, %v812_v59 }
  0xbe   :  { %v349_v0 = vpop.f32.mrf.mxu2  ;;  %v397_v1 = vpop.f32.mrf.mxu3 }
  0xbf   :  { %666 = vst [vmem:[%s1721_s2 + $0x118] sm:$0xff] %v349_v0  ;;  %v865_v2 = vadd.f32 %v864_v50, %v349_v0  ;;  %v888_v3 = vmul.f32 %v349_v0, %v349_v0  ;;  %v941_v4 = vadd.f32 %v940_v52, %v397_v1  ;;  %v964_v5 = vmul.f32 %v397_v1, %v397_v1  ;;  %v256_v6 = vpop.f32.mrf.mxu0  ;;  %v304_v7 = vpop.f32.mrf.mxu1 }
  0xc0   :  { %682 = vst [vmem:[%s1721_s2 + $0x198] sm:$0xff] %v397_v1  ;;  %v714_v8 = vadd.f32 %v713_v56, %v256_v6  ;;  %v737_v9 = vmul.f32 %v256_v6, %v256_v6  ;;  %v790_v10 = vadd.f32 %v789_v58, %v304_v7  ;;  %v813_v11 = vmul.f32 %v304_v7, %v304_v7 }
  0xc1   :  { %v903_v12 = vadd.f32 %v902_v60, %v888_v3  ;;  %v979_v13 = vadd.f32 %v978_v61, %v964_v5  ;;  %635 = vst [vmem:[%s1721_s2 + $0x20] sm:$0xff] %v256_v6 }
  0xc2   :  { %v752_v14 = vadd.f32 %v751_v62, %v737_v9  ;;  %651 = vst [vmem:[%s1721_s2 + $0xa0] sm:$0xff] %v304_v7  ;;  %v1374_v15 = vadd.f32 %v827_v63, %v813_v11 }
  0xc6   :  { %v352_v16 = vpop.f32.mrf.mxu2  ;;  %v400_v17 = vpop.f32.mrf.mxu3 }
  0xc7   :  { %667 = vst [vmem:[%s1721_s2 + $0x120] sm:$0xff] %v352_v16  ;;  %v1379_v18 = vadd.f32 %v865_v2, %v352_v16  ;;  %v889_v19 = vmul.f32 %v352_v16, %v352_v16  ;;  %v1381_v20 = vadd.f32 %v941_v4, %v400_v17  ;;  %v965_v21 = vmul.f32 %v400_v17, %v400_v17  ;;  %v259_v22 = vpop.f32.mrf.mxu0  ;;  %v307_v23 = vpop.f32.mrf.mxu1 }
  0xc8   :  { %683 = vst [vmem:[%s1721_s2 + $0x1a0] sm:$0xff] %v400_v17  ;;  %v1386_v24 = vadd.f32 %v714_v8, %v259_v22  ;;  %v738_v25 = vmul.f32 %v259_v22, %v259_v22  ;;  %v1388_v26 = vadd.f32 %v790_v10, %v307_v23  ;;  %v814_v54 = vmul.f32 %v307_v23, %v307_v23 }
  0xc9   :  { %v1390_v27 = vadd.f32 %v903_v12, %v889_v19  ;;  %v1392_v28 = vadd.f32 %v979_v13, %v965_v21  ;;  %636 = vst [vmem:[%s1721_s2 + $0x28] sm:$0xff] %v259_v22 }
  0xca   :  { %v1397_v29 = vadd.f32 %v752_v14, %v738_v25  ;;  %652 = vst [vmem:[%s1721_s2 + $0xa8] sm:$0xff] %v307_v23  ;;  %v829_v61 = vadd.f32 %v1374_v15, %v814_v54 }
  0xce   :  { %v355_v30 = vpop.f32.mrf.mxu2  ;;  %v403_v31 = vpop.f32.mrf.mxu3 }
  0xcf   :  { %668 = vst [vmem:[%s1721_s2 + $0x128] sm:$0xff] %v355_v30  ;;  %v262_v32 = vpop.f32.mrf.mxu0  ;;  %v310_v33 = vpop.f32.mrf.mxu1  ;;  %v890_v55 = vmul.f32 %v355_v30, %v355_v30  ;;  %v966_v56 = vmul.f32 %v403_v31, %v403_v31  ;;  %v867_v62 = vadd.f32 %v1379_v18, %v355_v30  ;;  %v943_v63 = vadd.f32 %v1381_v20, %v403_v31 }
  0xd0   :  { %684 = vst [vmem:[%s1721_s2 + $0x1a8] sm:$0xff] %v403_v31  ;;  %v739_v57 = vmul.f32 %v262_v32, %v262_v32  ;;  %v815_v58 = vmul.f32 %v310_v33, %v310_v33  ;;  %v716_v2 = vadd.f32 %v1386_v24, %v262_v32  ;;  %v792_v3 = vadd.f32 %v1388_v26, %v310_v33 }
  0xd1   :  { %637 = vst [vmem:[%s1721_s2 + $0x30] sm:$0xff] %v262_v32  ;;  %v905_v6 = vadd.f32 %v1390_v27, %v890_v55  ;;  %v981_v7 = vadd.f32 %v1392_v28, %v966_v56 }
  0xd2   :  { %653 = vst [vmem:[%s1721_s2 + $0xb0] sm:$0xff] %v310_v33  ;;  %v754_v10 = vadd.f32 %v1397_v29, %v739_v57  ;;  %v830_v11 = vadd.f32 %v829_v61, %v815_v58 }
  0xd6   :  { %v1414_v34 = vpop.f32.mrf.mxu2  ;;  %v1416_v35 = vpop.f32.mrf.mxu3 }
  0xd7   :  { %669 = vst [vmem:[%s1721_s2 + $0x130] sm:$0xff] %v1414_v34  ;;  %v1422_v36 = vpop.f32.mrf.mxu0  ;;  %v1424_v37 = vpop.f32.mrf.mxu1  ;;  %v891_v4 = vmul.f32 %v1414_v34, %v1414_v34  ;;  %v967_v5 = vmul.f32 %v1416_v35, %v1416_v35  ;;  %v868_v12 = vadd.f32 %v867_v62, %v1414_v34  ;;  %v944_v13 = vadd.f32 %v943_v63, %v1416_v35 }
  0xd8   :  { %685 = vst [vmem:[%s1721_s2 + $0x1b0] sm:$0xff] %v1416_v35  ;;  %v740_v8 = vmul.f32 %v1422_v36, %v1422_v36  ;;  %v816_v9 = vmul.f32 %v1424_v37, %v1424_v37  ;;  %v717_v14 = vadd.f32 %v716_v2, %v1422_v36  ;;  %v793_v15 = vadd.f32 %v792_v3, %v1424_v37 }
  0xd9   :  { %638 = vst [vmem:[%s1721_s2 + $0x38] sm:$0xff] %v1422_v36  ;;  %v906_v18 = vadd.f32 %v905_v6, %v891_v4  ;;  %v982_v19 = vadd.f32 %v981_v7, %v967_v5 }
  0xda   :  { %654 = vst [vmem:[%s1721_s2 + $0xb8] sm:$0xff] %v1424_v37  ;;  %v755_v22 = vadd.f32 %v754_v10, %v740_v8  ;;  %v831_v23 = vadd.f32 %v830_v11, %v816_v9 }
  0xde   :  { %v1438_v38 = vpop.f32.mrf.mxu2  ;;  %v1440_v39 = vpop.f32.mrf.mxu3 }
  0xdf   :  { %670 = vst [vmem:[%s1721_s2 + $0x138] sm:$0xff] %v1438_v38  ;;  %v1446_v40 = vpop.f32.mrf.mxu0  ;;  %v1448_v41 = vpop.f32.mrf.mxu1  ;;  %v892_v16 = vmul.f32 %v1438_v38, %v1438_v38  ;;  %v968_v17 = vmul.f32 %v1440_v39, %v1440_v39  ;;  %v869_v24 = vadd.f32 %v868_v12, %v1438_v38  ;;  %v945_v25 = vadd.f32 %v944_v13, %v1440_v39 }
  0xe0   :  { %686 = vst [vmem:[%s1721_s2 + $0x1b8] sm:$0xff] %v1440_v39  ;;  %v741_v20 = vmul.f32 %v1446_v40, %v1446_v40  ;;  %v817_v21 = vmul.f32 %v1448_v41, %v1448_v41  ;;  %v718_v26 = vadd.f32 %v717_v14, %v1446_v40  ;;  %v794_v27 = vadd.f32 %v793_v15, %v1448_v41 }
  0xe1   :  { %639 = vst [vmem:[%s1721_s2 + $0x40] sm:$0xff] %v1446_v40  ;;  %v907_v32 = vadd.f32 %v906_v18, %v892_v16  ;;  %v983_v33 = vadd.f32 %v982_v19, %v968_v17 }
  0xe2   :  { %655 = vst [vmem:[%s1721_s2 + $0xc0] sm:$0xff] %v1448_v41  ;;  %v756_v38 = vadd.f32 %v755_v22, %v741_v20  ;;  %v832_v39 = vadd.f32 %v831_v23, %v817_v21 }
  0xe6   :  { %v1462_v42 = vpop.f32.mrf.mxu2  ;;  %v1464_v43 = vpop.f32.mrf.mxu3 }
  0xe7   :  { %671 = vst [vmem:[%s1721_s2 + $0x140] sm:$0xff] %v1462_v42  ;;  %v1470_v44 = vpop.f32.mrf.mxu0  ;;  %v1472_v45 = vpop.f32.mrf.mxu1  ;;  %v893_v28 = vmul.f32 %v1462_v42, %v1462_v42  ;;  %v969_v29 = vmul.f32 %v1464_v43, %v1464_v43  ;;  %v870_v40 = vadd.f32 %v869_v24, %v1462_v42  ;;  %v946_v41 = vadd.f32 %v945_v25, %v1464_v43 }
  0xe8   :  { %687 = vst [vmem:[%s1721_s2 + $0x1c0] sm:$0xff] %v1464_v43  ;;  %v742_v34 = vmul.f32 %v1470_v44, %v1470_v44  ;;  %v818_v35 = vmul.f32 %v1472_v45, %v1472_v45  ;;  %v719_v54 = vadd.f32 %v718_v26, %v1470_v44  ;;  %v795_v55 = vadd.f32 %v794_v27, %v1472_v45 }
  0xe9   :  { %640 = vst [vmem:[%s1721_s2 + $0x48] sm:$0xff] %v1470_v44  ;;  %v908_v42 = vadd.f32 %v907_v32, %v893_v28  ;;  %v984_v43 = vadd.f32 %v983_v33, %v969_v29 }
  0xea   :  { %656 = vst [vmem:[%s1721_s2 + $0xc8] sm:$0xff] %v1472_v45  ;;  %v757_v45 = vadd.f32 %v756_v38, %v742_v34  ;;  %v833_v61 = vadd.f32 %v832_v39, %v818_v35 }
  0xee   :  { %v1486_v46 = vpop.f32.mrf.mxu2  ;;  %v1488_v47 = vpop.f32.mrf.mxu3 }
  0xef   :  { %672 = vst [vmem:[%s1721_s2 + $0x148] sm:$0xff] %v1486_v46  ;;  %v1494_v48 = vpop.f32.mrf.mxu0  ;;  %v1496_v49 = vpop.f32.mrf.mxu1  ;;  %v894_v56 = vmul.f32 %v1486_v46, %v1486_v46  ;;  %v970_v57 = vmul.f32 %v1488_v47, %v1488_v47  ;;  %v871_v62 = vadd.f32 %v870_v40, %v1486_v46  ;;  %v947_v63 = vadd.f32 %v946_v41, %v1488_v47 }
  0xf0   :  { %688 = vst [vmem:[%s1721_s2 + $0x1c8] sm:$0xff] %v1488_v47  ;;  %v743_v58 = vmul.f32 %v1494_v48, %v1494_v48  ;;  %v819_v44 = vmul.f32 %v1496_v49, %v1496_v49  ;;  %v720_v2 = vadd.f32 %v719_v54, %v1494_v48  ;;  %v796_v3 = vadd.f32 %v795_v55, %v1496_v49 }
  0xf1   :  { %641 = vst [vmem:[%s1721_s2 + $0x50] sm:$0xff] %v1494_v48  ;;  %v909_v6 = vadd.f32 %v908_v42, %v894_v56  ;;  %v985_v7 = vadd.f32 %v984_v43, %v970_v57 }
  0xf2   :  { %657 = vst [vmem:[%s1721_s2 + $0xd0] sm:$0xff] %v1496_v49  ;;  %v758_v9 = vadd.f32 %v757_v45, %v743_v58  ;;  %v834_v47 = vadd.f32 %v833_v61, %v819_v44 }
  0xf6   :  { %v1510_v50 = vpop.f32.mrf.mxu2  ;;  %v1512_v51 = vpop.f32.mrf.mxu3 }
  0xf7   :  { %673 = vst [vmem:[%s1721_s2 + $0x150] sm:$0xff] %v1510_v50  ;;  %v1518_v52 = vpop.f32.mrf.mxu0  ;;  %v1520_v53 = vpop.f32.mrf.mxu1  ;;  %v895_v4 = vmul.f32 %v1510_v50, %v1510_v50  ;;  %v971_v5 = vmul.f32 %v1512_v51, %v1512_v51  ;;  %v872_v48 = vadd.f32 %v871_v62, %v1510_v50  ;;  %v948_v49 = vadd.f32 %v947_v63, %v1512_v51 }
  0xf8   :  { %689 = vst [vmem:[%s1721_s2 + $0x1d0] sm:$0xff] %v1512_v51  ;;  %v744_v8 = vmul.f32 %v1518_v52, %v1518_v52  ;;  %v820_v46 = vmul.f32 %v1520_v53, %v1520_v53  ;;  %v721_v12 = vadd.f32 %v720_v2, %v1518_v52  ;;  %v797_v13 = vadd.f32 %v796_v3, %v1520_v53 }
  0xf9   :  { %642 = vst [vmem:[%s1721_s2 + $0x58] sm:$0xff] %v1518_v52  ;;  %v910_v16 = vadd.f32 %v909_v6, %v895_v4  ;;  %v986_v17 = vadd.f32 %v985_v7, %v971_v5 }
  0xfa   :  { %658 = vst [vmem:[%s1721_s2 + $0xd8] sm:$0xff] %v1520_v53  ;;  %v759_v18 = vadd.f32 %v758_v9, %v744_v8  ;;  %v835_v19 = vadd.f32 %v834_v47, %v820_v46 }
  0xfe   :  { %v1534_v59 = vpop.f32.mrf.mxu2  ;;  %v1536_v60 = vpop.f32.mrf.mxu3 }
  0xff   :  { %674 = vst [vmem:[%s1721_s2 + $0x158] sm:$0xff] %v1534_v59  ;;  %v1545_v0 = vpop.f32.mrf.mxu0  ;;  %v1547_v1 = vpop.f32.mrf.mxu1  ;;  %v896_v52 = vmul.f32 %v1534_v59, %v1534_v59  ;;  %v972_v53 = vmul.f32 %v1536_v60, %v1536_v60  ;;  %v873_v22 = vadd.f32 %v872_v48, %v1534_v59  ;;  %v949_v23 = vadd.f32 %v948_v49, %v1536_v60 }
 0x100   :  { %690 = vst [vmem:[%s1721_s2 + $0x1d8] sm:$0xff] %v1536_v60  ;;  %v745_v14 = vmul.f32 %v1545_v0, %v1545_v0  ;;  %v821_v15 = vmul.f32 %v1547_v1, %v1547_v1  ;;  %v722_v24 = vadd.f32 %v721_v12, %v1545_v0  ;;  %v798_v25 = vadd.f32 %v797_v13, %v1547_v1 }
 0x101   :  { %643 = vst [vmem:[%s1721_s2 + $0x60] sm:$0xff] %v1545_v0  ;;  %v911_v32 = vadd.f32 %v910_v16, %v896_v52  ;;  %v987_v33 = vadd.f32 %v986_v17, %v972_v53 }
 0x102   :  { %659 = vst [vmem:[%s1721_s2 + $0xe0] sm:$0xff] %v1547_v1  ;;  %v760_v26 = vadd.f32 %v759_v18, %v745_v14  ;;  %v836_v27 = vadd.f32 %v835_v19, %v821_v15 }
 0x106   :  { %v1594_v30 = vpop.f32.mrf.mxu2  ;;  %v1596_v31 = vpop.f32.mrf.mxu3 }
 0x107   :  { %675 = vst [vmem:[%s1721_s2 + $0x160] sm:$0xff] %v1594_v30  ;;  %v1606_v36 = vpop.f32.mrf.mxu0  ;;  %v1608_v37 = vpop.f32.mrf.mxu1  ;;  %v897_v60 = vmul.f32 %v1594_v30, %v1594_v30  ;;  %v973_v0 = vmul.f32 %v1596_v31, %v1596_v31  ;;  %v874_v38 = vadd.f32 %v873_v22, %v1594_v30  ;;  %v950_v39 = vadd.f32 %v949_v23, %v1596_v31 }
 0x108   :  { %691 = vst [vmem:[%s1721_s2 + $0x1e0] sm:$0xff] %v1596_v31  ;;  %v746_v20 = vmul.f32 %v1606_v36, %v1606_v36  ;;  %v822_v21 = vmul.f32 %v1608_v37, %v1608_v37  ;;  %v723_v34 = vadd.f32 %v722_v24, %v1606_v36  ;;  %v799_v59 = vadd.f32 %v798_v25, %v1608_v37 }
 0x109   :  { %644 = vst [vmem:[%s1721_s2 + $0x68] sm:$0xff] %v1606_v36  ;;  %v912_v45 = vadd.f32 %v911_v32, %v897_v60  ;;  %v988_v61 = vadd.f32 %v987_v33, %v973_v0 }
 0x10a   :  { %660 = vst [vmem:[%s1721_s2 + $0xe8] sm:$0xff] %v1608_v37  ;;  %v761_v1 = vadd.f32 %v760_v26, %v746_v20  ;;  %v837_v35 = vadd.f32 %v836_v27, %v822_v21 }
 0x10e   :  { %v1648_v10 = vpop.f32.mrf.mxu2  ;;  %v1650_v11 = vpop.f32.mrf.mxu3 }
 0x10f   :  { %676 = vst [vmem:[%s1721_s2 + $0x168] sm:$0xff] %v1648_v10  ;;  %v286_v50 = vpop.f32.mrf.mxu0  ;;  %v334_v51 = vpop.f32.mrf.mxu1  ;;  %v898_v36 = vmul.f32 %v1648_v10, %v1648_v10  ;;  %v974_v37 = vmul.f32 %v1650_v11, %v1650_v11  ;;  %v875_v6 = vadd.f32 %v874_v38, %v1648_v10  ;;  %v951_v8 = vadd.f32 %v950_v39, %v1650_v11 }
 0x110   :  { %692 = vst [vmem:[%s1721_s2 + $0x1e8] sm:$0xff] %v1650_v11  ;;  %v747_v28 = vmul.f32 %v286_v50, %v286_v50  ;;  %v823_v29 = vmul.f32 %v334_v51, %v334_v51  ;;  %v724_v40 = vadd.f32 %v723_v34, %v286_v50  ;;  %v800_v41 = vadd.f32 %v799_v59, %v334_v51 }
 0x111   :  { %645 = vst [vmem:[%s1721_s2 + $0x70] sm:$0xff] %v286_v50  ;;  %v913_v7 = vadd.f32 %v912_v45, %v898_v36  ;;  %v989_v46 = vadd.f32 %v988_v61, %v974_v37 }
 0x112   :  { %661 = vst [vmem:[%s1721_s2 + $0xf0] sm:$0xff] %v334_v51  ;;  %v762_v56 = vadd.f32 %v761_v1, %v747_v28  ;;  %v838_v57 = vadd.f32 %v837_v35, %v823_v29 }
 0x116   :  { %v382_v54 = vpop.f32.mrf.mxu2  ;;  %v430_v55 = vpop.f32.mrf.mxu3 }
 0x117   :  { %677 = vst [vmem:[%s1721_s2 + $0x170] sm:$0xff] %v382_v54  ;;  %v289_v42 = vpop.f32.mrf.mxu0  ;;  %v337_v30 = vpop.f32.mrf.mxu1  ;;  %v899_v62 = vmul.f32 %v382_v54, %v382_v54  ;;  %v975_v63 = vmul.f32 %v430_v55, %v430_v55  ;;  %v876_v12 = vadd.f32 %v875_v6, %v382_v54  ;;  %v952_v14 = vadd.f32 %v951_v8, %v430_v55 }
 0x118   :  { %693 = vst [vmem:[%s1721_s2 + $0x1f0] sm:$0xff] %v430_v55  ;;  %v725_v31 = vadd.f32 %v724_v40, %v289_v42  ;;  %v748_v43 = vmul.f32 %v289_v42, %v289_v42  ;;  %v801_v58 = vadd.f32 %v800_v41, %v337_v30  ;;  %v824_v44 = vmul.f32 %v337_v30, %v337_v30 }
 0x119   :  { %646 = vst [vmem:[%s1721_s2 + $0x78] sm:$0xff] %v289_v42  ;;  %v914_v13 = vadd.f32 %v913_v7, %v899_v62  ;;  %v990_v15 = vadd.f32 %v989_v46, %v975_v63 }
 0x11a   :  { %v726_v2 = vrot.slane %v725_v31, 4  ;;  %v763_v3 = vadd.f32 %v762_v56, %v748_v43  ;;  %662 = vst [vmem:[%s1721_s2 + $0xf8] sm:$0xff] %v337_v30  ;;  %v802_v4 = vrot.slane %v801_v58, 4  ;;  %v839_v5 = vadd.f32 %v838_v57, %v824_v44 }
 0x11c   :  { %v727_v9 = vadd.f32 %v726_v2, %v725_v31  ;;  %v764_v47 = vrot.slane %v763_v3, 4  ;;  %v803_v48 = vadd.f32 %v802_v4, %v801_v58  ;;  %v840_v49 = vrot.slane %v839_v5, 4 }
 0x11e   :  { %v728_v50 = vrot.slane %v727_v9, 2  ;;  %v765_v51 = vadd.f32 %v764_v47, %v763_v3  ;;  %v804_v16 = vrot.slane %v803_v48, 2  ;;  %v841_v17 = vadd.f32 %v840_v49, %v839_v5  ;;  %v385_v52 = vpop.f32.mrf.mxu2  ;;  %v433_v53 = vpop.f32.mrf.mxu3 }
 0x11f   :  { %678 = vst [vmem:[%s1721_s2 + $0x178] sm:$0xff] %v385_v52  ;;  %v877_v10 = vadd.f32 %v876_v12, %v385_v52  ;;  %v900_v11 = vmul.f32 %v385_v52, %v385_v52  ;;  %v953_v18 = vadd.f32 %v952_v14, %v433_v53  ;;  %v976_v19 = vmul.f32 %v433_v53, %v433_v53 }
 0x120   :  { %v729_v20 = vadd.f32 %v728_v50, %v727_v9  ;;  %v766_v21 = vrot.slane %v765_v51, 2  ;;  %v805_v22 = vadd.f32 %v804_v16, %v803_v48  ;;  %v842_v23 = vrot.slane %v841_v17, 2  ;;  %694 = vst [vmem:[%s1721_s2 + $0x1f8] sm:$0xff] %v433_v53 }
 0x121   :  { %v878_v24 = vrot.slane %v877_v10, 4  ;;  %v915_v25 = vadd.f32 %v914_v13, %v900_v11  ;;  %v954_v26 = vrot.slane %v953_v18, 4  ;;  %v991_v27 = vadd.f32 %v990_v15, %v976_v19 }
 0x122   :  { %v730_v28 = vrot.slane %v729_v20, 1  ;;  %v767_v29 = vadd.f32 %v766_v21, %v765_v51  ;;  %v806_v32 = vrot.slane %v805_v22, 1  ;;  %v843_v33 = vadd.f32 %v842_v23, %v841_v17 }
 0x123   :  { %v879_v34 = vadd.f32 %v878_v24, %v877_v10  ;;  %v916_v59 = vrot.slane %v915_v25, 4  ;;  %v955_v60 = vadd.f32 %v954_v26, %v953_v18  ;;  %v992_v0 = vrot.slane %v991_v27, 4 }
 0x124   :  { %v731_v1 = vadd.f32 %v730_v28, %v729_v20  ;;  %v768_v35 = vrot.slane %v767_v29, 1  ;;  %v807_v38 = vadd.f32 %v806_v32, %v805_v22  ;;  %v844_v39 = vrot.slane %v843_v33, 1 }
 0x125   :  { %v880_v40 = vrot.slane %v879_v34, 2  ;;  %v917_v41 = vadd.f32 %v916_v59, %v915_v25  ;;  %v956_v54 = vrot.slane %v955_v60, 2  ;;  %v993_v55 = vadd.f32 %v992_v0, %v991_v27 }
 0x126   :  { %v769_v36 = vadd.f32 %v768_v35, %v767_v29  ;;  %v808_v37 = vadd.f32 %v807_v38, %v731_v1  ;;  %v845_v56 = vadd.f32 %v844_v39, %v843_v33 }
 0x127   :  { %v881_v57 = vadd.f32 %v880_v40, %v879_v34  ;;  %v918_v42 = vrot.slane %v917_v41, 2  ;;  %v957_v30 = vadd.f32 %v956_v54, %v955_v60  ;;  %v994_v31 = vrot.slane %v993_v55, 2 }
 0x128   :  { %v846_v43 = vadd.f32 %v845_v56, %v769_v36 }
 0x129   :  { %v882_v58 = vrot.slane %v881_v57, 1  ;;  %v919_v44 = vadd.f32 %v918_v42, %v917_v41  ;;  %v958_v45 = vrot.slane %v957_v30, 1  ;;  %v995_v61 = vadd.f32 %v994_v31, %v993_v55 }
 0x12b   :  { %v883_v62 = vadd.f32 %v882_v58, %v881_v57  ;;  %v920_v63 = vrot.slane %v919_v44, 1  ;;  %v996_v2 = vrot.slane %v995_v61, 1  ;;  %v959_v5 = vadd.f32 %v958_v45, %v957_v30 }
 0x12d   :  { %v884_v3 = vadd.f32 %v883_v62, %v808_v37  ;;  %v921_v4 = vadd.f32 %v920_v63, %v919_v44  ;;  %v997_v8 = vadd.f32 %v996_v2, %v995_v61 }
 0x12f   :  { %v922_v6 = vadd.f32 %v921_v4, %v846_v43  ;;  %v960_v7 = vadd.f32 %v959_v5, %v884_v3 }
 0x131   :  { %v998_v46 = vadd.f32 %v997_v8, %v922_v6 }
 0x133   :  { %v1000_v9 = vsel %vm999_vm0, %v960_v7, %v998_v46 }
 0x134   :  { %v1002_v47 = vsel %vm1001_vm1, %v1000_v9, 0.0 }
 0x135   :  { %1003 = vst [vmem:[%s1722_s3] sm:$0xff] %v1002_v47 }

</bundles_post_ra>
